<compile_context>
chip_gen: v7x
topology: tpu7x:2x2x1
jax: 0.10.0
libtpu: 0.0.40
codegen_flags: <defaults>
</compile_context>

<pallas_src>
import functools

import jax
import jax.numpy as jnp
from jax import lax
from jax.experimental import pallas as pl
from jax.experimental.pallas import tpu as pltpu

_LANE = 128     # vreg lane width
_SUBLANE = 8    # f32 sublane count


def _round_up(x, m):
    return (x + m - 1) // m * m


def _sigmoid(x):
    # Exact identity sigmoid(x) = 0.5*tanh(0.5*x) + 0.5 : one EUP op + one VPU fma.
    return 0.5 * jnp.tanh(0.5 * x) + 0.5


# ---------------------------------------------------------------------------
# LSTM branch kernel. Grid = (batch_block, time_chunk); time is the inner
# ("arbitrary") axis so the recurrent state carries across chunks.
# ---------------------------------------------------------------------------
def lstm_kernel(z1_ref, win_ref, bin_ref, wih_ref, bg_ref, whh_ref,
                wout_ref, bout_ref,
                o1_ref,
                h_scr, c_scr, xg_scr, hs_scr):
    f32, bf16 = jnp.float32, jnp.bfloat16
    t_idx = pl.program_id(1)
    Tc, BB, nx1 = z1_ref.shape
    Hp = h_scr.shape[1]

    # (1) Reset the recurrent state at the first time chunk of every batch block.
    @pl.when(t_idx == 0)
    def _init():
        h_scr[...] = jnp.zeros_like(h_scr)
        c_scr[...] = jnp.zeros_like(c_scr)

    # (2) linearIn + ReLU and the input->gates projection for the whole chunk.
    #     The combined gate bias (bih + bhh) is folded in here, OUTSIDE the recurrence.
    #     BB is a multiple of 8, so the (Tc,BB,nx1)->(Tc*BB,nx1) merge is layout-preserving.
    z1_2d = z1_ref[...].reshape(Tc * BB, nx1).astype(bf16)
    x0 = jnp.maximum(
        jnp.dot(z1_2d, win_ref[...], preferred_element_type=f32) + bin_ref[...], 0.0)
    xg_scr[...] = (jnp.dot(x0.astype(bf16), wih_ref[...],
                           preferred_element_type=f32) + bg_ref[...])

    # (3) Serial LSTM recurrence (PyTorch gate order i, f, g, o).
    #     h/c live in vregs via the fori_loop carry; VMEM is only touched for the
    #     per-step hidden-state stash and the cross-chunk carry at the chunk edges.
    whh = whh_ref[...]                      # hoisted out of the loop; f32 on purpose

    def step(tt, carry):
        h, c = carry
        r = pl.ds(pl.multiple_of(tt * BB, BB), BB)          # sublane-aligned rows
        gates = xg_scr[r, :] + jnp.dot(h, whh, preferred_element_type=f32)
        i_g = _sigmoid(gates[:, 0 * Hp:1 * Hp])
        f_g = _sigmoid(gates[:, 1 * Hp:2 * Hp])
        g_g = jnp.tanh(gates[:, 2 * Hp:3 * Hp])
        o_g = _sigmoid(gates[:, 3 * Hp:4 * Hp])
        c = f_g * c + i_g * g_g
        h = o_g * jnp.tanh(c)
        hs_scr[r, :] = h                                     # store only (off the dep chain)
        return (h, c)

    h_fin, c_fin = lax.fori_loop(0, Tc, step, (h_scr[...], c_scr[...]),
                                 unroll=min(Tc, 8))
    h_scr[...] = h_fin                                       # cross-chunk carry
    c_scr[...] = c_fin

    # (4) linearOut + sigmoid for the chunk; bf16 store halves padded HBM write traffic.
    pre = (jnp.dot(hs_scr[...].astype(bf16), wout_ref[...],
                   preferred_element_type=f32) + bout_ref[...])
    o1_ref[...] = _sigmoid(pre).reshape(o1_ref.shape).astype(o1_ref.dtype)


# ---------------------------------------------------------------------------
# ANN branch kernel: tiny, one block, computed exactly once.
# ---------------------------------------------------------------------------
def ann_kernel(z2_ref, w1_ref, b1_ref, w2_ref, b2_ref, w3_ref, b3_ref, o2_ref):
    f32, bf16 = jnp.float32, jnp.bfloat16
    h1 = jnp.maximum(
        jnp.dot(z2_ref[...], w1_ref[...], preferred_element_type=f32) + b1_ref[...], 0.0)
    h2 = jnp.maximum(
        jnp.dot(h1.astype(bf16), w2_ref[...], preferred_element_type=f32) + b2_ref[...], 0.0)
    o2_ref[...] = (jnp.dot(h2.astype(bf16), w3_ref[...],
                           preferred_element_type=f32) + b3_ref[...])


# ---------------------------------------------------------------------------
# Wrapper: zero-padding (lane/sublane alignment), bf16 weight prep, grid construction.
# All padding is with zeros and is mathematically exact for this model.
# ---------------------------------------------------------------------------
@functools.partial(jax.jit, static_argnames=("t_chunk", "batch_block"))
def lstm_mlp_forward(z1, z2, params, *, t_chunk=32, batch_block=8):
    """Pallas forward for LstmMlpModel. Returns (sigmoid(lstm_out), ann_out)."""
    assert batch_block % _SUBLANE == 0
    T, B, nx1 = z1.shape
    N2, nx2 = z2.shape
    H1 = params["win"].shape[1]
    ny1 = params["wout"].shape[1]
    H2 = params["w1"].shape[1]
    ny2 = params["w3"].shape[1]

    f32, bf16 = jnp.float32, jnp.bfloat16

    Hp = _round_up(H1, _LANE)
    H2p = _round_up(H2, _LANE)
    ny1p = _round_up(ny1, _LANE)
    ny2p = _round_up(ny2, _LANE)
    BB = batch_block
    Bp = _round_up(B, BB)
    n_b = Bp // BB
    Tc = min(t_chunk, T)
    Tp = _round_up(T, Tc)
    n_t = Tp // Tc

    def pad2(a, rows, cols, dtype):
        a = a.astype(f32)
        return jnp.pad(a, ((0, rows - a.shape[0]), (0, cols - a.shape[1]))).astype(dtype)

    def pad_gate_w(w, dtype):   # (H1, 4*H1) -> (Hp, 4*Hp); each gate block padded separately
        w4 = w.astype(f32).reshape(H1, 4, H1)
        w4 = jnp.pad(w4, ((0, Hp - H1), (0, 0), (0, Hp - H1)))
        return w4.reshape(Hp, 4 * Hp).astype(dtype)

    def pad_gate_b(b):          # (1, 4*H1) -> (1, 4*Hp)
        b4 = b.astype(f32).reshape(1, 4, H1)
        b4 = jnp.pad(b4, ((0, 0), (0, 0), (0, Hp - H1)))
        return b4.reshape(1, 4 * Hp)

    # LSTM branch weights. whh stays f32 so recurrent rounding error does not compound.
    winp = pad2(params["win"], nx1, Hp, bf16)
    binp = pad2(params["bin"], 1, Hp, f32)
    wihp = pad_gate_w(params["wih"], bf16)
    whhp = pad_gate_w(params["whh"], f32)
    bg = pad_gate_b(params["bih"]) + pad_gate_b(params["bhh"])     # folded gate bias
    woutp = pad2(params["wout"], Hp, ny1p, bf16)
    boutp = pad2(params["bout"], 1, ny1p, f32)

    # z1 stays in its natural (T, B, nx1) layout: zero-pad only, no wrapper transposes.
    z1p = jnp.pad(z1.astype(f32), ((0, Tp - T), (0, Bp - B), (0, 0)))

    def _full(arr):
        zeros = (0,) * arr.ndim
        return pl.BlockSpec(arr.shape, lambda b, t: zeros)

    grid = (n_b, n_t)
    in_specs = [
        pl.BlockSpec((Tc, BB, nx1), lambda b, t: (t, b, 0)),        # streamed z1
        _full(winp), _full(binp), _full(wihp), _full(bg), _full(whhp),
        _full(woutp), _full(boutp),
    ]
    out_spec = pl.BlockSpec((Tc, BB, ny1p), lambda b, t: (t, b, 0))  # streamed lstm out
    scratch = [
        pltpu.VMEM((BB, Hp), f32),            # h (cross-chunk carry)
        pltpu.VMEM((BB, Hp), f32),            # c (cross-chunk carry)
        pltpu.VMEM((Tc * BB, 4 * Hp), f32),   # precomputed x-gates (+ folded biases)
        pltpu.VMEM((Tc * BB, Hp), f32),       # hidden states for this chunk
    ]

    lstm_p = pl.pallas_call(
        lstm_kernel,
        out_shape=jax.ShapeDtypeStruct((Tp, Bp, ny1p), bf16),
        grid_spec=pltpu.PrefetchScalarGridSpec(
            num_scalar_prefetch=0,
            grid=grid,
            in_specs=in_specs,
            out_specs=out_spec,
            scratch_shapes=scratch),
        compiler_params=pltpu.CompilerParams(
            dimension_semantics=("parallel", "arbitrary"),
            # Plenty for the demo; raise toward ~48/64 MiB when scaling Tc/BB on
            # v7x (64 MiB physical) / v6e-v5e (128 MiB physical).
            vmem_limit_bytes=32 * 1024 * 1024),
    )(z1p, winp, binp, wihp, bg, whhp, woutp, boutp)

    lstm_out = lstm_p[:T, :B, :ny1].astype(f32)

    # ANN branch: separate tiny single-block call (computed once, no redundant
    # per-batch-block work, no wasted output allocation).
    N2p = _round_up(N2, _SUBLANE)
    z2p = jnp.pad(z2.astype(f32), ((0, N2p - N2), (0, 0))).astype(bf16)
    w1p = pad2(params["w1"], nx2, H2p, bf16)
    b1p = pad2(params["b1"], 1, H2p, f32)
    w2p = pad2(params["w2"], H2p, H2p, bf16)
    b2p = pad2(params["b2"], 1, H2p, f32)
    w3p = pad2(params["w3"], H2p, ny2p, bf16)
    b3p = pad2(params["b3"], 1, ny2p, f32)

    ann_p = pl.pallas_call(
        ann_kernel,
        out_shape=jax.ShapeDtypeStruct((N2p, ny2p), f32),
    )(z2p, w1p, b1p, w2p, b2p, w3p, b3p)
    ann_out = ann_p[:N2, :ny2]

    return lstm_out, ann_out


# ---------------------------------------------------------------------------
# Pure-JAX reference (mirrors the PyTorch forward, full f32) for correctness check.
# ---------------------------------------------------------------------------
def lstm_mlp_reference(z1, z2, p):
    T, B, _ = z1.shape
    H = p["win"].shape[1]
    x0 = jnp.maximum(z1 @ p["win"] + p["bin"], 0.0)

    def step(carry, xt):
        h, c = carry
        gates = xt @ p["wih"] + p["bih"][0] + h @ p["whh"] + p["bhh"][0]
        i = jax.nn.sigmoid(gates[:, 0 * H:1 * H])
        f = jax.nn.sigmoid(gates[:, 1 * H:2 * H])
        g = jnp.tanh(gates[:, 2 * H:3 * H])
        o = jax.nn.sigmoid(gates[:, 3 * H:4 * H])
        c = f * c + i * g
        h = o * jnp.tanh(c)
        return (h, c), h

    init = (jnp.zeros((B, H), jnp.float32), jnp.zeros((B, H), jnp.float32))
    _, hs = lax.scan(step, init, x0)
    lstm_out = jax.nn.sigmoid(hs @ p["wout"] + p["bout"])

    h1 = jnp.maximum(z2 @ p["w1"] + p["b1"], 0.0)
    h2 = jnp.maximum(h1 @ p["w2"] + p["b2"], 0.0)
    ann_out = h2 @ p["w3"] + p["b3"]
    return lstm_out, ann_out


def init_params(key, nx1, ny1, H1, nx2, ny2, H2):
    """Deterministic uniform init (PyTorch-style scale); weights stored (in, out)."""
    ks = jax.random.split(key, 16)

    def u(k, shape, fan_in):
        bound = 1.0 / jnp.sqrt(jnp.float32(fan_in))
        return jax.random.uniform(k, shape, jnp.float32, -bound, bound)

    return {
        # LSTM branch
        "win":  u(ks[0], (nx1, H1), nx1),
        "bin":  u(ks[1], (1, H1), nx1),
        "wih":  u(ks[2], (H1, 4 * H1), H1),
        "bih":  u(ks[3], (1, 4 * H1), H1),
        "whh":  u(ks[4], (H1, 4 * H1), H1),
        "bhh":  u(ks[5], (1, 4 * H1), H1),
        "wout": u(ks[6], (H1, ny1), H1),
        "bout": u(ks[7], (1, ny1), H1),
        # ANN branch
        "w1": u(ks[8], (nx2, H2), nx2),
        "b1": u(ks[9], (1, H2), nx2),
        "w2": u(ks[10], (H2, H2), H2),
        "b2": u(ks[11], (1, H2), H2),
        "w3": u(ks[12], (H2, ny2), H2),
        "b3": u(ks[13], (1, ny2), H2),
    }


if __name__ == "__main__":
    # Small shapes consistent with the module's forward.
    T, B = 8, 2            # sequence length, batch (z1: [T, B, nx1])
    nx1, ny1, H1 = 6, 5, 32
    N2 = 4                 # rows of MLP input (z2: [N2, nx2])
    nx2, ny2, H2 = 10, 3, 16

    key = jax.random.PRNGKey(0)
    k1, k2, k3 = jax.random.split(key, 3)
    z1 = jax.random.normal(k1, (T, B, nx1), jnp.float32)
    z2 = jax.random.normal(k2, (N2, nx2), jnp.float32)
    params = init_params(k3, nx1, ny1, H1, nx2, ny2, H2)

    # t_chunk=4 -> 2 time chunks so the streaming grid / cross-chunk carry is exercised.
    lstm_out, ann_out = lstm_mlp_forward(z1, z2, params, t_chunk=4, batch_block=8)
    jax.block_until_ready((lstm_out, ann_out))

    ref_lstm, ref_ann = lstm_mlp_reference(z1, z2, params)
    assert lstm_out.shape == (T, B, ny1) and ann_out.shape == (N2, ny2)
    # bf16 MXU operands / bf16 output store (f32 recurrence) -> modest tolerance.
    assert jnp.allclose(lstm_out, ref_lstm, atol=2e-2, rtol=2e-2), \
        float(jnp.max(jnp.abs(lstm_out - ref_lstm)))
    assert jnp.allclose(ann_out, ref_ann, atol=5e-2, rtol=5e-2), \
        float(jnp.max(jnp.abs(ann_out - ref_ann)))

    print("KERNEL_OK")
</pallas_src>

<mosaic_0001>
module attributes {stable_mosaic.version = 11 : i64} {
  func.func @ann_kernel(%arg0: memref<8x10xbf16, #tpu.memory_space<vmem>>, %arg1: memref<10x128xbf16, #tpu.memory_space<vmem>>, %arg2: memref<1x128xf32, #tpu.memory_space<vmem>>, %arg3: memref<128x128xbf16, #tpu.memory_space<vmem>>, %arg4: memref<1x128xf32, #tpu.memory_space<vmem>>, %arg5: memref<128x128xbf16, #tpu.memory_space<vmem>>, %arg6: memref<1x128xf32, #tpu.memory_space<vmem>>, %arg7: memref<8x128xf32, #tpu.memory_space<vmem>>) attributes {dimension_semantics = [], scalar_prefetch = 0 : i64, scratch_operands = 0 : i64, tpu.core_type = #tpu.core_type<tc>} {
    %c0 = arith.constant 0 : index
    %c0_0 = arith.constant 0 : index
    %0 = vector.load %arg0[%c0, %c0_0] : memref<8x10xbf16, #tpu.memory_space<vmem>>, vector<8x10xbf16>
    %c0_1 = arith.constant 0 : index
    %c0_2 = arith.constant 0 : index
    %1 = vector.load %arg1[%c0_1, %c0_2] : memref<10x128xbf16, #tpu.memory_space<vmem>>, vector<10x128xbf16>
    %cst = arith.constant dense<0.000000e+00> : vector<8x128xf32>
    %2 = tpu.matmul %0, %1, %cst {dimension_numbers = #tpu.dot_dimension_numbers<[1], [0], [0], [1], [0, 0, 1, 1], [], []>} : vector<8x10xbf16>, vector<10x128xbf16>, vector<8x128xf32> -> vector<8x128xf32>
    %c0_3 = arith.constant 0 : index
    %c0_4 = arith.constant 0 : index
    %3 = vector.load %arg2[%c0_3, %c0_4] : memref<1x128xf32, #tpu.memory_space<vmem>>, vector<1x128xf32>
    %4 = vector.broadcast %3 : vector<1x128xf32> to vector<8x128xf32>
    %5 = arith.addf %2, %4 : vector<8x128xf32>
    %cst_5 = arith.constant 0.000000e+00 : f32
    %6 = vector.broadcast %cst_5 : f32 to vector<8x128xf32>
    %7 = arith.maximumf %5, %6 : vector<8x128xf32>
    %8 = arith.truncf %7 : vector<8x128xf32> to vector<8x128xbf16>
    %c0_6 = arith.constant 0 : index
    %c0_7 = arith.constant 0 : index
    %9 = vector.load %arg3[%c0_6, %c0_7] : memref<128x128xbf16, #tpu.memory_space<vmem>>, vector<128x128xbf16>
    %cst_8 = arith.constant dense<0.000000e+00> : vector<8x128xf32>
    %10 = tpu.matmul %8, %9, %cst_8 {dimension_numbers = #tpu.dot_dimension_numbers<[1], [0], [0], [1], [0, 0, 1, 1], [], []>} : vector<8x128xbf16>, vector<128x128xbf16>, vector<8x128xf32> -> vector<8x128xf32>
    %c0_9 = arith.constant 0 : index
    %c0_10 = arith.constant 0 : index
    %11 = vector.load %arg4[%c0_9, %c0_10] : memref<1x128xf32, #tpu.memory_space<vmem>>, vector<1x128xf32>
    %12 = vector.broadcast %11 : vector<1x128xf32> to vector<8x128xf32>
    %13 = arith.addf %10, %12 : vector<8x128xf32>
    %cst_11 = arith.constant 0.000000e+00 : f32
    %14 = vector.broadcast %cst_11 : f32 to vector<8x128xf32>
    %15 = arith.maximumf %13, %14 : vector<8x128xf32>
    %16 = arith.truncf %15 : vector<8x128xf32> to vector<8x128xbf16>
    %c0_12 = arith.constant 0 : index
    %c0_13 = arith.constant 0 : index
    %17 = vector.load %arg5[%c0_12, %c0_13] : memref<128x128xbf16, #tpu.memory_space<vmem>>, vector<128x128xbf16>
    %cst_14 = arith.constant dense<0.000000e+00> : vector<8x128xf32>
    %18 = tpu.matmul %16, %17, %cst_14 {dimension_numbers = #tpu.dot_dimension_numbers<[1], [0], [0], [1], [0, 0, 1, 1], [], []>} : vector<8x128xbf16>, vector<128x128xbf16>, vector<8x128xf32> -> vector<8x128xf32>
    %c0_15 = arith.constant 0 : index
    %c0_16 = arith.constant 0 : index
    %19 = vector.load %arg6[%c0_15, %c0_16] : memref<1x128xf32, #tpu.memory_space<vmem>>, vector<1x128xf32>
    %20 = vector.broadcast %19 : vector<1x128xf32> to vector<8x128xf32>
    %21 = arith.addf %18, %20 : vector<8x128xf32>
    %c0_17 = arith.constant 0 : index
    %c0_18 = arith.constant 0 : index
    %22 = vector.load %arg7[%c0_17, %c0_18] : memref<8x128xf32, #tpu.memory_space<vmem>>, vector<8x128xf32>
    tpu.vector_store %arg7[%c0_17, %c0_18], %21 {strides = array<i32>} : memref<8x128xf32, #tpu.memory_space<vmem>>, vector<8x128xf32>,
    return
  }
}

module attributes {stable_mosaic.version = 11 : i64} {
  func.func @lstm_kernel(%arg0: i32, %arg1: i32, %arg2: memref<4x8x6xf32, #tpu.memory_space<vmem>>, %arg3: memref<6x128xbf16, #tpu.memory_space<vmem>>, %arg4: memref<1x128xf32, #tpu.memory_space<vmem>>, %arg5: memref<128x512xbf16, #tpu.memory_space<vmem>>, %arg6: memref<1x512xf32, #tpu.memory_space<vmem>>, %arg7: memref<128x512xf32, #tpu.memory_space<vmem>>, %arg8: memref<128x128xbf16, #tpu.memory_space<vmem>>, %arg9: memref<1x128xf32, #tpu.memory_space<vmem>>, %arg10: memref<4x8x128xbf16, #tpu.memory_space<vmem>>, %arg11: memref<8x128xf32, #tpu.memory_space<vmem>>, %arg12: memref<8x128xf32, #tpu.memory_space<vmem>>, %arg13: memref<32x512xf32, #tpu.memory_space<vmem>>, %arg14: memref<32x128xf32, #tpu.memory_space<vmem>>) attributes {dimension_semantics = [#tpu.dimension_semantics<parallel>, #tpu.dimension_semantics<arbitrary>], iteration_bounds = array<i64: 1, 2>, scalar_prefetch = 0 : i64, scratch_operands = 4 : i64, tpu.core_type = #tpu.core_type<tc>, window_params = [{transform_indices = @transform_0, window_bounds = array<i64: 4, 8, 6>}, {pipeline_mode = #tpu.pipeline_mode<synchronous>, transform_indices = @transform_1, window_bounds = array<i64: 6, 128>}, {pipeline_mode = #tpu.pipeline_mode<synchronous>, transform_indices = @transform_2, window_bounds = array<i64: 1, 128>}, {pipeline_mode = #tpu.pipeline_mode<synchronous>, transform_indices = @transform_3, window_bounds = array<i64: 128, 512>}, {pipeline_mode = #tpu.pipeline_mode<synchronous>, transform_indices = @transform_4, window_bounds = array<i64: 1, 512>}, {pipeline_mode = #tpu.pipeline_mode<synchronous>, transform_indices = @transform_5, window_bounds = array<i64: 128, 512>}, {pipeline_mode = #tpu.pipeline_mode<synchronous>, transform_indices = @transform_6, window_bounds = array<i64: 128, 128>}, {pipeline_mode = #tpu.pipeline_mode<synchronous>, transform_indices = @transform_7, window_bounds = array<i64: 1, 128>}, {transform_indices = @transform_8, window_bounds = array<i64: 4, 8, 128>}]} {
    %c0_i32 = arith.constant 0 : i32
    %0 = arith.cmpi eq, %arg1, %c0_i32 : i32
    %1 = arith.extui %0 : i1 to i32
    %c0_i32_0 = arith.constant 0 : i32
    %2 = arith.cmpi ne, %1, %c0_i32_0 : i32
    scf.if %2 {
      %cst_90 = arith.constant 0.000000e+00 : f32
      %198 = vector.broadcast %cst_90 : f32 to vector<8x128xf32>
      %c0_91 = arith.constant 0 : index
      %c0_92 = arith.constant 0 : index
      %199 = vector.load %arg11[%c0_91, %c0_92] : memref<8x128xf32, #tpu.memory_space<vmem>>, vector<8x128xf32>
      tpu.vector_store %arg11[%c0_91, %c0_92], %198 {strides = array<i32>} : memref<8x128xf32, #tpu.memory_space<vmem>>, vector<8x128xf32>,
      %cst_93 = arith.constant 0.000000e+00 : f32
      %200 = vector.broadcast %cst_93 : f32 to vector<8x128xf32>
      %c0_94 = arith.constant 0 : index
      %c0_95 = arith.constant 0 : index
      %201 = vector.load %arg12[%c0_94, %c0_95] : memref<8x128xf32, #tpu.memory_space<vmem>>, vector<8x128xf32>
      tpu.vector_store %arg12[%c0_94, %c0_95], %200 {strides = array<i32>} : memref<8x128xf32, #tpu.memory_space<vmem>>, vector<8x128xf32>,
    } else {
    }
    %c0 = arith.constant 0 : index
    %c0_1 = arith.constant 0 : index
    %c0_2 = arith.constant 0 : index
    %3 = vector.load %arg2[%c0, %c0_1, %c0_2] : memref<4x8x6xf32, #tpu.memory_space<vmem>>, vector<4x8x6xf32>
    %4 = vector.shape_cast %3 : vector<4x8x6xf32> to vector<32x6xf32>
    %5 = arith.truncf %4 : vector<32x6xf32> to vector<32x6xbf16>
    %c0_3 = arith.constant 0 : index
    %c0_4 = arith.constant 0 : index
    %6 = vector.load %arg3[%c0_3, %c0_4] : memref<6x128xbf16, #tpu.memory_space<vmem>>, vector<6x128xbf16>
    %cst = arith.constant dense<0.000000e+00> : vector<32x128xf32>
    %7 = tpu.matmul %5, %6, %cst {dimension_numbers = #tpu.dot_dimension_numbers<[1], [0], [0], [1], [0, 0, 1, 1], [], []>} : vector<32x6xbf16>, vector<6x128xbf16>, vector<32x128xf32> -> vector<32x128xf32>
    %c0_5 = arith.constant 0 : index
    %c0_6 = arith.constant 0 : index
    %8 = vector.load %arg4[%c0_5, %c0_6] : memref<1x128xf32, #tpu.memory_space<vmem>>, vector<1x128xf32>
    %9 = vector.broadcast %8 : vector<1x128xf32> to vector<32x128xf32>
    %10 = arith.addf %7, %9 : vector<32x128xf32>
    %cst_7 = arith.constant 0.000000e+00 : f32
    %11 = vector.broadcast %cst_7 : f32 to vector<32x128xf32>
    %12 = arith.maximumf %10, %11 : vector<32x128xf32>
    %13 = arith.truncf %12 : vector<32x128xf32> to vector<32x128xbf16>
    %c0_8 = arith.constant 0 : index
    %c0_9 = arith.constant 0 : index
    %14 = vector.load %arg5[%c0_8, %c0_9] : memref<128x512xbf16, #tpu.memory_space<vmem>>, vector<128x512xbf16>
    %cst_10 = arith.constant dense<0.000000e+00> : vector<32x512xf32>
    %15 = tpu.matmul %13, %14, %cst_10 {dimension_numbers = #tpu.dot_dimension_numbers<[1], [0], [0], [1], [0, 0, 1, 1], [], []>} : vector<32x128xbf16>, vector<128x512xbf16>, vector<32x512xf32> -> vector<32x512xf32>
    %c0_11 = arith.constant 0 : index
    %c0_12 = arith.constant 0 : index
    %16 = vector.load %arg6[%c0_11, %c0_12] : memref<1x512xf32, #tpu.memory_space<vmem>>, vector<1x512xf32>
    %17 = vector.broadcast %16 : vector<1x512xf32> to vector<32x512xf32>
    %18 = arith.addf %15, %17 : vector<32x512xf32>
    %c0_13 = arith.constant 0 : index
    %c0_14 = arith.constant 0 : index
    %19 = vector.load %arg13[%c0_13, %c0_14] : memref<32x512xf32, #tpu.memory_space<vmem>>, vector<32x512xf32>
    tpu.vector_store %arg13[%c0_13, %c0_14], %18 {strides = array<i32>} : memref<32x512xf32, #tpu.memory_space<vmem>>, vector<32x512xf32>,
    %c0_15 = arith.constant 0 : index
    %c0_16 = arith.constant 0 : index
    %20 = vector.load %arg7[%c0_15, %c0_16] : memref<128x512xf32, #tpu.memory_space<vmem>>, vector<128x512xf32>
    %c0_17 = arith.constant 0 : index
    %c0_18 = arith.constant 0 : index
    %21 = vector.load %arg11[%c0_17, %c0_18] : memref<8x128xf32, #tpu.memory_space<vmem>>, vector<8x128xf32>
    %c0_19 = arith.constant 0 : index
    %c0_20 = arith.constant 0 : index
    %22 = vector.load %arg12[%c0_19, %c0_20] : memref<8x128xf32, #tpu.memory_space<vmem>>, vector<8x128xf32>
    %c0_i32_21 = arith.constant 0 : i32
    %c8_i32 = arith.constant 8 : i32
    %23 = arith.muli %c0_i32_21, %c8_i32 : i32
    %24 = tpu.assume_multiple %23, 8 : i32
    %25 = arith.index_cast %24 : i32 to index
    %c0_22 = arith.constant 0 : index
    %26 = vector.load %arg13[%25, %c0_22] : memref<32x512xf32, #tpu.memory_space<vmem>>, vector<8x512xf32>
    %cst_23 = arith.constant dense<0.000000e+00> : vector<8x512xf32>
    %27 = tpu.matmul %21, %20, %cst_23 {dimension_numbers = #tpu.dot_dimension_numbers<[1], [0], [0], [1], [0, 0, 1, 1], [], []>} : vector<8x128xf32>, vector<128x512xf32>, vector<8x512xf32> -> vector<8x512xf32>
    %28 = arith.addf %26, %27 : vector<8x512xf32>
    %29 = vector.extract_strided_slice %28 {offsets = [0, 0], sizes = [8, 128], strides = [1, 1]} : vector<8x512xf32> to vector<8x128xf32>
    %cst_24 = arith.constant 5.000000e-01 : f32
    %30 = vector.broadcast %cst_24 : f32 to vector<8x128xf32>
    %31 = arith.mulf %30, %29 : vector<8x128xf32>
    %32 = math.tanh %31 : vector<8x128xf32>
    %cst_25 = arith.constant 5.000000e-01 : f32
    %33 = vector.broadcast %cst_25 : f32 to vector<8x128xf32>
    %34 = arith.mulf %33, %32 : vector<8x128xf32>
    %cst_26 = arith.constant 5.000000e-01 : f32
    %35 = vector.broadcast %cst_26 : f32 to vector<8x128xf32>
    %36 = arith.addf %34, %35 : vector<8x128xf32>
    %37 = vector.extract_strided_slice %28 {offsets = [0, 128], sizes = [8, 128], strides = [1, 1]} : vector<8x512xf32> to vector<8x128xf32>
    %cst_27 = arith.constant 5.000000e-01 : f32
    %38 = vector.broadcast %cst_27 : f32 to vector<8x128xf32>
    %39 = arith.mulf %38, %37 : vector<8x128xf32>
    %40 = math.tanh %39 : vector<8x128xf32>
    %cst_28 = arith.constant 5.000000e-01 : f32
    %41 = vector.broadcast %cst_28 : f32 to vector<8x128xf32>
    %42 = arith.mulf %41, %40 : vector<8x128xf32>
    %cst_29 = arith.constant 5.000000e-01 : f32
    %43 = vector.broadcast %cst_29 : f32 to vector<8x128xf32>
    %44 = arith.addf %42, %43 : vector<8x128xf32>
    %45 = vector.extract_strided_slice %28 {offsets = [0, 256], sizes = [8, 128], strides = [1, 1]} : vector<8x512xf32> to vector<8x128xf32>
    %46 = math.tanh %45 : vector<8x128xf32>
    %47 = vector.extract_strided_slice %28 {offsets = [0, 384], sizes = [8, 128], strides = [1, 1]} : vector<8x512xf32> to vector<8x128xf32>
    %cst_30 = arith.constant 5.000000e-01 : f32
    %48 = vector.broadcast %cst_30 : f32 to vector<8x128xf32>
    %49 = arith.mulf %48, %47 : vector<8x128xf32>
    %50 = math.tanh %49 : vector<8x128xf32>
    %cst_31 = arith.constant 5.000000e-01 : f32
    %51 = vector.broadcast %cst_31 : f32 to vector<8x128xf32>
    %52 = arith.mulf %51, %50 : vector<8x128xf32>
    %cst_32 = arith.constant 5.000000e-01 : f32
    %53 = vector.broadcast %cst_32 : f32 to vector<8x128xf32>
    %54 = arith.addf %52, %53 : vector<8x128xf32>
    %55 = arith.mulf %44, %22 : vector<8x128xf32>
    %56 = arith.mulf %36, %46 : vector<8x128xf32>
    %57 = arith.addf %55, %56 : vector<8x128xf32>
    %58 = math.tanh %57 : vector<8x128xf32>
    %59 = arith.mulf %54, %58 : vector<8x128xf32>
    %60 = arith.index_cast %24 : i32 to index
    %c0_33 = arith.constant 0 : index
    %61 = vector.load %arg14[%60, %c0_33] : memref<32x128xf32, #tpu.memory_space<vmem>>, vector<8x128xf32>
    tpu.vector_store %arg14[%60, %c0_33], %59 {strides = array<i32>} : memref<32x128xf32, #tpu.memory_space<vmem>>, vector<8x128xf32>,
    %c1_i32 = arith.constant 1 : i32
    %c8_i32_34 = arith.constant 8 : i32
    %62 = arith.muli %c1_i32, %c8_i32_34 : i32
    %63 = tpu.assume_multiple %62, 8 : i32
    %64 = arith.index_cast %63 : i32 to index
    %c0_35 = arith.constant 0 : index
    %65 = vector.load %arg13[%64, %c0_35] : memref<32x512xf32, #tpu.memory_space<vmem>>, vector<8x512xf32>
    %cst_36 = arith.constant dense<0.000000e+00> : vector<8x512xf32>
    %66 = tpu.matmul %59, %20, %cst_36 {dimension_numbers = #tpu.dot_dimension_numbers<[1], [0], [0], [1], [0, 0, 1, 1], [], []>} : vector<8x128xf32>, vector<128x512xf32>, vector<8x512xf32> -> vector<8x512xf32>
    %67 = arith.addf %65, %66 : vector<8x512xf32>
    %68 = vector.extract_strided_slice %67 {offsets = [0, 0], sizes = [8, 128], strides = [1, 1]} : vector<8x512xf32> to vector<8x128xf32>
    %cst_37 = arith.constant 5.000000e-01 : f32
    %69 = vector.broadcast %cst_37 : f32 to vector<8x128xf32>
    %70 = arith.mulf %69, %68 : vector<8x128xf32>
    %71 = math.tanh %70 : vector<8x128xf32>
    %cst_38 = arith.constant 5.000000e-01 : f32
    %72 = vector.broadcast %cst_38 : f32 to vector<8x128xf32>
    %73 = arith.mulf %72, %71 : vector<8x128xf32>
    %cst_39 = arith.constant 5.000000e-01 : f32
    %74 = vector.broadcast %cst_39 : f32 to vector<8x128xf32>
    %75 = arith.addf %73, %74 : vector<8x128xf32>
    %76 = vector.extract_strided_slice %67 {offsets = [0, 128], sizes = [8, 128], strides = [1, 1]} : vector<8x512xf32> to vector<8x128xf32>
    %cst_40 = arith.constant 5.000000e-01 : f32
    %77 = vector.broadcast %cst_40 : f32 to vector<8x128xf32>
    %78 = arith.mulf %77, %76 : vector<8x128xf32>
    %79 = math.tanh %78 : vector<8x128xf32>
    %cst_41 = arith.constant 5.000000e-01 : f32
    %80 = vector.broadcast %cst_41 : f32 to vector<8x128xf32>
    %81 = arith.mulf %80, %79 : vector<8x128xf32>
    %cst_42 = arith.constant 5.000000e-01 : f32
    %82 = vector.broadcast %cst_42 : f32 to vector<8x128xf32>
    %83 = arith.addf %81, %82 : vector<8x128xf32>
    %84 = vector.extract_strided_slice %67 {offsets = [0, 256], sizes = [8, 128], strides = [1, 1]} : vector<8x512xf32> to vector<8x128xf32>
    %85 = math.tanh %84 : vector<8x128xf32>
    %86 = vector.extract_strided_slice %67 {offsets = [0, 384], sizes = [8, 128], strides = [1, 1]} : vector<8x512xf32> to vector<8x128xf32>
    %cst_43 = arith.constant 5.000000e-01 : f32
    %87 = vector.broadcast %cst_43 : f32 to vector<8x128xf32>
    %88 = arith.mulf %87, %86 : vector<8x128xf32>
    %89 = math.tanh %88 : vector<8x128xf32>
    %cst_44 = arith.constant 5.000000e-01 : f32
    %90 = vector.broadcast %cst_44 : f32 to vector<8x128xf32>
    %91 = arith.mulf %90, %89 : vector<8x128xf32>
    %cst_45 = arith.constant 5.000000e-01 : f32
    %92 = vector.broadcast %cst_45 : f32 to vector<8x128xf32>
    %93 = arith.addf %91, %92 : vector<8x128xf32>
    %94 = arith.mulf %83, %57 : vector<8x128xf32>
    %95 = arith.mulf %75, %85 : vector<8x128xf32>
    %96 = arith.addf %94, %95 : vector<8x128xf32>
    %97 = math.tanh %96 : vector<8x128xf32>
    %98 = arith.mulf %93, %97 : vector<8x128xf32>
    %99 = arith.index_cast %63 : i32 to index
    %c0_46 = arith.constant 0 : index
    %100 = vector.load %arg14[%99, %c0_46] : memref<32x128xf32, #tpu.memory_space<vmem>>, vector<8x128xf32>
    tpu.vector_store %arg14[%99, %c0_46], %98 {strides = array<i32>} : memref<32x128xf32, #tpu.memory_space<vmem>>, vector<8x128xf32>,
    %c2_i32 = arith.constant 2 : i32
    %c8_i32_47 = arith.constant 8 : i32
    %101 = arith.muli %c2_i32, %c8_i32_47 : i32
    %102 = tpu.assume_multiple %101, 8 : i32
    %103 = arith.index_cast %102 : i32 to index
    %c0_48 = arith.constant 0 : index
    %104 = vector.load %arg13[%103, %c0_48] : memref<32x512xf32, #tpu.memory_space<vmem>>, vector<8x512xf32>
    %cst_49 = arith.constant dense<0.000000e+00> : vector<8x512xf32>
    %105 = tpu.matmul %98, %20, %cst_49 {dimension_numbers = #tpu.dot_dimension_numbers<[1], [0], [0], [1], [0, 0, 1, 1], [], []>} : vector<8x128xf32>, vector<128x512xf32>, vector<8x512xf32> -> vector<8x512xf32>
    %106 = arith.addf %104, %105 : vector<8x512xf32>
    %107 = vector.extract_strided_slice %106 {offsets = [0, 0], sizes = [8, 128], strides = [1, 1]} : vector<8x512xf32> to vector<8x128xf32>
    %cst_50 = arith.constant 5.000000e-01 : f32
    %108 = vector.broadcast %cst_50 : f32 to vector<8x128xf32>
    %109 = arith.mulf %108, %107 : vector<8x128xf32>
    %110 = math.tanh %109 : vector<8x128xf32>
    %cst_51 = arith.constant 5.000000e-01 : f32
    %111 = vector.broadcast %cst_51 : f32 to vector<8x128xf32>
    %112 = arith.mulf %111, %110 : vector<8x128xf32>
    %cst_52 = arith.constant 5.000000e-01 : f32
    %113 = vector.broadcast %cst_52 : f32 to vector<8x128xf32>
    %114 = arith.addf %112, %113 : vector<8x128xf32>
    %115 = vector.extract_strided_slice %106 {offsets = [0, 128], sizes = [8, 128], strides = [1, 1]} : vector<8x512xf32> to vector<8x128xf32>
    %cst_53 = arith.constant 5.000000e-01 : f32
    %116 = vector.broadcast %cst_53 : f32 to vector<8x128xf32>
    %117 = arith.mulf %116, %115 : vector<8x128xf32>
    %118 = math.tanh %117 : vector<8x128xf32>
    %cst_54 = arith.constant 5.000000e-01 : f32
    %119 = vector.broadcast %cst_54 : f32 to vector<8x128xf32>
    %120 = arith.mulf %119, %118 : vector<8x128xf32>
    %cst_55 = arith.constant 5.000000e-01 : f32
    %121 = vector.broadcast %cst_55 : f32 to vector<8x128xf32>
    %122 = arith.addf %120, %121 : vector<8x128xf32>
    %123 = vector.extract_strided_slice %106 {offsets = [0, 256], sizes = [8, 128], strides = [1, 1]} : vector<8x512xf32> to vector<8x128xf32>
    %124 = math.tanh %123 : vector<8x128xf32>
    %125 = vector.extract_strided_slice %106 {offsets = [0, 384], sizes = [8, 128], strides = [1, 1]} : vector<8x512xf32> to vector<8x128xf32>
    %cst_56 = arith.constant 5.000000e-01 : f32
    %126 = vector.broadcast %cst_56 : f32 to vector<8x128xf32>
    %127 = arith.mulf %126, %125 : vector<8x128xf32>
    %128 = math.tanh %127 : vector<8x128xf32>
    %cst_57 = arith.constant 5.000000e-01 : f32
    %129 = vector.broadcast %cst_57 : f32 to vector<8x128xf32>
    %130 = arith.mulf %129, %128 : vector<8x128xf32>
    %cst_58 = arith.constant 5.000000e-01 : f32
    %131 = vector.broadcast %cst_58 : f32 to vector<8x128xf32>
    %132 = arith.addf %130, %131 : vector<8x128xf32>
    %133 = arith.mulf %122, %96 : vector<8x128xf32>
    %134 = arith.mulf %114, %124 : vector<8x128xf32>
    %135 = arith.addf %133, %134 : vector<8x128xf32>
    %136 = math.tanh %135 : vector<8x128xf32>
    %137 = arith.mulf %132, %136 : vector<8x128xf32>
    %138 = arith.index_cast %102 : i32 to index
    %c0_59 = arith.constant 0 : index
    %139 = vector.load %arg14[%138, %c0_59] : memref<32x128xf32, #tpu.memory_space<vmem>>, vector<8x128xf32>
    tpu.vector_store %arg14[%138, %c0_59], %137 {strides = array<i32>} : memref<32x128xf32, #tpu.memory_space<vmem>>, vector<8x128xf32>,
    %c3_i32 = arith.constant 3 : i32
    %c8_i32_60 = arith.constant 8 : i32
    %140 = arith.muli %c3_i32, %c8_i32_60 : i32
    %141 = tpu.assume_multiple %140, 8 : i32
    %142 = arith.index_cast %141 : i32 to index
    %c0_61 = arith.constant 0 : index
    %143 = vector.load %arg13[%142, %c0_61] : memref<32x512xf32, #tpu.memory_space<vmem>>, vector<8x512xf32>
    %cst_62 = arith.constant dense<0.000000e+00> : vector<8x512xf32>
    %144 = tpu.matmul %137, %20, %cst_62 {dimension_numbers = #tpu.dot_dimension_numbers<[1], [0], [0], [1], [0, 0, 1, 1], [], []>} : vector<8x128xf32>, vector<128x512xf32>, vector<8x512xf32> -> vector<8x512xf32>
    %145 = arith.addf %143, %144 : vector<8x512xf32>
    %146 = vector.extract_strided_slice %145 {offsets = [0, 0], sizes = [8, 128], strides = [1, 1]} : vector<8x512xf32> to vector<8x128xf32>
    %cst_63 = arith.constant 5.000000e-01 : f32
    %147 = vector.broadcast %cst_63 : f32 to vector<8x128xf32>
    %148 = arith.mulf %147, %146 : vector<8x128xf32>
    %149 = math.tanh %148 : vector<8x128xf32>
    %cst_64 = arith.constant 5.000000e-01 : f32
    %150 = vector.broadcast %cst_64 : f32 to vector<8x128xf32>
    %151 = arith.mulf %150, %149 : vector<8x128xf32>
    %cst_65 = arith.constant 5.000000e-01 : f32
    %152 = vector.broadcast %cst_65 : f32 to vector<8x128xf32>
    %153 = arith.addf %151, %152 : vector<8x128xf32>
    %154 = vector.extract_strided_slice %145 {offsets = [0, 128], sizes = [8, 128], strides = [1, 1]} : vector<8x512xf32> to vector<8x128xf32>
    %cst_66 = arith.constant 5.000000e-01 : f32
    %155 = vector.broadcast %cst_66 : f32 to vector<8x128xf32>
    %156 = arith.mulf %155, %154 : vector<8x128xf32>
    %157 = math.tanh %156 : vector<8x128xf32>
    %cst_67 = arith.constant 5.000000e-01 : f32
    %158 = vector.broadcast %cst_67 : f32 to vector<8x128xf32>
    %159 = arith.mulf %158, %157 : vector<8x128xf32>
    %cst_68 = arith.constant 5.000000e-01 : f32
    %160 = vector.broadcast %cst_68 : f32 to vector<8x128xf32>
    %161 = arith.addf %159, %160 : vector<8x128xf32>
    %162 = vector.extract_strided_slice %145 {offsets = [0, 256], sizes = [8, 128], strides = [1, 1]} : vector<8x512xf32> to vector<8x128xf32>
    %163 = math.tanh %162 : vector<8x128xf32>
    %164 = vector.extract_strided_slice %145 {offsets = [0, 384], sizes = [8, 128], strides = [1, 1]} : vector<8x512xf32> to vector<8x128xf32>
    %cst_69 = arith.constant 5.000000e-01 : f32
    %165 = vector.broadcast %cst_69 : f32 to vector<8x128xf32>
    %166 = arith.mulf %165, %164 : vector<8x128xf32>
    %167 = math.tanh %166 : vector<8x128xf32>
    %cst_70 = arith.constant 5.000000e-01 : f32
    %168 = vector.broadcast %cst_70 : f32 to vector<8x128xf32>
    %169 = arith.mulf %168, %167 : vector<8x128xf32>
    %cst_71 = arith.constant 5.000000e-01 : f32
    %170 = vector.broadcast %cst_71 : f32 to vector<8x128xf32>
    %171 = arith.addf %169, %170 : vector<8x128xf32>
    %172 = arith.mulf %161, %135 : vector<8x128xf32>
    %173 = arith.mulf %153, %163 : vector<8x128xf32>
    %174 = arith.addf %172, %173 : vector<8x128xf32>
    %175 = math.tanh %174 : vector<8x128xf32>
    %176 = arith.mulf %171, %175 : vector<8x128xf32>
    %177 = arith.index_cast %141 : i32 to index
    %c0_72 = arith.constant 0 : index
    %178 = vector.load %arg14[%177, %c0_72] : memref<32x128xf32, #tpu.memory_space<vmem>>, vector<8x128xf32>
    tpu.vector_store %arg14[%177, %c0_72], %176 {strides = array<i32>} : memref<32x128xf32, #tpu.memory_space<vmem>>, vector<8x128xf32>,
    %c4_i32 = arith.constant 4 : i32
    %c0_73 = arith.constant 0 : index
    %c0_74 = arith.constant 0 : index
    %179 = vector.load %arg11[%c0_73, %c0_74] : memref<8x128xf32, #tpu.memory_space<vmem>>, vector<8x128xf32>
    tpu.vector_store %arg11[%c0_73, %c0_74], %176 {strides = array<i32>} : memref<8x128xf32, #tpu.memory_space<vmem>>, vector<8x128xf32>,
    %c0_75 = arith.constant 0 : index
    %c0_76 = arith.constant 0 : index
    %180 = vector.load %arg12[%c0_75, %c0_76] : memref<8x128xf32, #tpu.memory_space<vmem>>, vector<8x128xf32>
    tpu.vector_store %arg12[%c0_75, %c0_76], %174 {strides = array<i32>} : memref<8x128xf32, #tpu.memory_space<vmem>>, vector<8x128xf32>,
    %c0_77 = arith.constant 0 : index
    %c0_78 = arith.constant 0 : index
    %181 = vector.load %arg14[%c0_77, %c0_78] : memref<32x128xf32, #tpu.memory_space<vmem>>, vector<32x128xf32>
    %182 = arith.truncf %181 : vector<32x128xf32> to vector<32x128xbf16>
    %c0_79 = arith.constant 0 : index
    %c0_80 = arith.constant 0 : index
    %183 = vector.load %arg8[%c0_79, %c0_80] : memref<128x128xbf16, #tpu.memory_space<vmem>>, vector<128x128xbf16>
    %cst_81 = arith.constant dense<0.000000e+00> : vector<32x128xf32>
    %184 = tpu.matmul %182, %183, %cst_81 {dimension_numbers = #tpu.dot_dimension_numbers<[1], [0], [0], [1], [0, 0, 1, 1], [], []>} : vector<32x128xbf16>, vector<128x128xbf16>, vector<32x128xf32> -> vector<32x128xf32>
    %c0_82 = arith.constant 0 : index
    %c0_83 = arith.constant 0 : index
    %185 = vector.load %arg9[%c0_82, %c0_83] : memref<1x128xf32, #tpu.memory_space<vmem>>, vector<1x128xf32>
    %186 = vector.broadcast %185 : vector<1x128xf32> to vector<32x128xf32>
    %187 = arith.addf %184, %186 : vector<32x128xf32>
    %cst_84 = arith.constant 5.000000e-01 : f32
    %188 = vector.broadcast %cst_84 : f32 to vector<32x128xf32>
    %189 = arith.mulf %188, %187 : vector<32x128xf32>
    %190 = math.tanh %189 : vector<32x128xf32>
    %cst_85 = arith.constant 5.000000e-01 : f32
    %191 = vector.broadcast %cst_85 : f32 to vector<32x128xf32>
    %192 = arith.mulf %191, %190 : vector<32x128xf32>
    %cst_86 = arith.constant 5.000000e-01 : f32
    %193 = vector.broadcast %cst_86 : f32 to vector<32x128xf32>
    %194 = arith.addf %192, %193 : vector<32x128xf32>
    %195 = vector.shape_cast %194 : vector<32x128xf32> to vector<4x8x128xf32>
    %196 = arith.truncf %195 : vector<4x8x128xf32> to vector<4x8x128xbf16>
    %c0_87 = arith.constant 0 : index
    %c0_88 = arith.constant 0 : index
    %c0_89 = arith.constant 0 : index
    %197 = vector.load %arg10[%c0_87, %c0_88, %c0_89] : memref<4x8x128xbf16, #tpu.memory_space<vmem>>, vector<4x8x128xbf16>
    tpu.vector_store %arg10[%c0_87, %c0_88, %c0_89], %196 {strides = array<i32>} : memref<4x8x128xbf16, #tpu.memory_space<vmem>>, vector<4x8x128xbf16>,
    return
  }
  func.func @transform_0(%arg0: i32, %arg1: i32) -> (i32, i32, i32) {
    %c0_i32 = arith.constant 0 : i32
    %c0_i32_0 = arith.constant 0 : i32
    return %arg1, %arg0, %c0_i32 : i32, i32, i32
  }
  func.func @transform_1(%arg0: i32, %arg1: i32) -> (i32, i32) {
    %c0_i32 = arith.constant 0 : i32
    %c0_i32_0 = arith.constant 0 : i32
    %c0_i32_1 = arith.constant 0 : i32
    return %c0_i32, %c0_i32_0 : i32, i32
  }
  func.func @transform_2(%arg0: i32, %arg1: i32) -> (i32, i32) {
    %c0_i32 = arith.constant 0 : i32
    %c0_i32_0 = arith.constant 0 : i32
    %c0_i32_1 = arith.constant 0 : i32
    return %c0_i32, %c0_i32_0 : i32, i32
  }
  func.func @transform_3(%arg0: i32, %arg1: i32) -> (i32, i32) {
    %c0_i32 = arith.constant 0 : i32
    %c0_i32_0 = arith.constant 0 : i32
    %c0_i32_1 = arith.constant 0 : i32
    return %c0_i32, %c0_i32_0 : i32, i32
  }
  func.func @transform_4(%arg0: i32, %arg1: i32) -> (i32, i32) {
    %c0_i32 = arith.constant 0 : i32
    %c0_i32_0 = arith.constant 0 : i32
    %c0_i32_1 = arith.constant 0 : i32
    return %c0_i32, %c0_i32_0 : i32, i32
  }
  func.func @transform_5(%arg0: i32, %arg1: i32) -> (i32, i32) {
    %c0_i32 = arith.constant 0 : i32
    %c0_i32_0 = arith.constant 0 : i32
    %c0_i32_1 = arith.constant 0 : i32
    return %c0_i32, %c0_i32_0 : i32, i32
  }
  func.func @transform_6(%arg0: i32, %arg1: i32) -> (i32, i32) {
    %c0_i32 = arith.constant 0 : i32
    %c0_i32_0 = arith.constant 0 : i32
    %c0_i32_1 = arith.constant 0 : i32
    return %c0_i32, %c0_i32_0 : i32, i32
  }
  func.func @transform_7(%arg0: i32, %arg1: i32) -> (i32, i32) {
    %c0_i32 = arith.constant 0 : i32
    %c0_i32_0 = arith.constant 0 : i32
    %c0_i32_1 = arith.constant 0 : i32
    return %c0_i32, %c0_i32_0 : i32, i32
  }
  func.func @transform_8(%arg0: i32, %arg1: i32) -> (i32, i32, i32) {
    %c0_i32 = arith.constant 0 : i32
    %c0_i32_0 = arith.constant 0 : i32
    return %arg1, %arg0, %c0_i32 : i32, i32, i32
  }
}

</mosaic_0001>

<bundles_post_ra>
// kernel: lstm_mlp_forward.3
= control target key start
LH: loop header
LB: loop body
LE: loop exit
PB: predicated region body
PF: predicated region fallthrough
CT: control target
= control target key end

     0   :  { %vm46_vm0 = vcmask 1044480   ;;  %v427_v0 = vmov 0.0   ;;  %vm428_vm1 = vmmov 0   ;;  %vm42_vm2 = vcmask 80896   ;;  %s558_s1 = inlined_call_operand.vmem [shape: bf16[10,128], index: 1, kind: input, shape index: {}]   ;;  %s559_s3 = inlined_call_operand.vmem [shape: bf16[128,128], index: 3, kind: input, shape index: {}]   ;;  %s560_s0 = inlined_call_operand.vmem [shape: bf16[8,10], index: 0, kind: input, shape index: {}]   ;;  %s561_s5 = inlined_call_operand.vmem [shape: bf16[128,128], index: 5, kind: input, shape index: {}]   ;;  %s562_s2 = inlined_call_operand.vmem [shape: f32[1,128], index: 2, kind: input, shape index: {}]   ;;  %s563_s4 = inlined_call_operand.vmem [shape: f32[1,128], index: 4, kind: input, shape index: {}]   ;;  %s564_s6 = inlined_call_operand.vmem [shape: f32[1,128], index: 6, kind: input, shape index: {}]   ;;  %s565_s7 = inlined_call_operand.vmem [shape: f32[8,128], index: 7, kind: output, shape index: {}]  }
   0x1   :  { %362 = vmatprep.subr.bf16.mxu0 %v427_v0  ;;  %v410_v1 = vld [vmem:[%s558_s1] sm:$0x1f]   ;;  %364 = vmatprep.mubr.msk.bf16.mxu0 %vm428_vm1, %v427_v0  ;;  %v412_v5 = vld [vmem:[%s559_s3 + $0x8] sm:$0xff]   ;;  %v413_v6 = vld [vmem:[%s559_s3 + $0x10] sm:$0xff]  }
   0x2   :  { %368 = vmatprep.subr.bf16.mxu1 %v427_v0  ;;  %384 = vmatprep.mubr.msk.bf16.mxu1 %vm428_vm1, %v427_v0  ;;  %v48_v2 = vsel %vm46_vm0, %v410_v1, 0  ;;  %v411_v3 = vld [vmem:[%s559_s3] sm:$0xff]   ;;  %v414_v7 = vld [vmem:[%s559_s3 + $0x18] sm:$0xff]   ;;  %v416_v9 = vld [vmem:[%s559_s3 + $0x28] sm:$0xff]  }
   0x3   :  { %363 = vmatpush3.bf16.msra.mxu0 %v48_v2  ;;  %v27_v4 = vld [vmem:[%s560_s0] sm:$0xf]  ;;  %369 = vmatpush3.bf16.msra.mxu1 %v411_v3  ;;  %v417_v10 = vld [vmem:[%s559_s3 + $0x30] sm:$0xff]   ;;  %v418_v11 = vld [vmem:[%s559_s3 + $0x38] sm:$0xff]  }
   0x4   :  { %388 = vmatprep.subr.bf16.mxu0 %v427_v0  ;;  %370 = vmatprep.subr.bf16.mxu1 %v427_v0  ;;  %v415_v8 = vld [vmem:[%s559_s3 + $0x20] sm:$0xff]   ;;  %v420_v13 = vld [vmem:[%s561_s5 + $0x8] sm:$0xff]   ;;  %v421_v14 = vld [vmem:[%s561_s5 + $0x10] sm:$0xff]  }
   0x5   :  { %v419_v12 = vld [vmem:[%s561_s5] sm:$0xff]   ;;  %v422_v15 = vld [vmem:[%s561_s5 + $0x18] sm:$0xff]   ;;  %v424_v17 = vld [vmem:[%s561_s5 + $0x28] sm:$0xff]  }
   0x6   :  { %365 = vmatmul.mubr.msk.bf16.vlgmr.msra.gmra.mrb[0].mxu0 %vm42_vm2, %v27_v4  ;;  %v423_v16 = vld [vmem:[%s561_s5 + $0x20] sm:$0xff]   ;;  %v425_v26 = vld [vmem:[%s561_s5 + $0x30] sm:$0xff]   ;;  %v426_v27 = vld [vmem:[%s561_s5 + $0x38] sm:$0xff]  }
   0x7   :  { %404 = vmatprep.mubr.msk.bf16.mxu0 %vm428_vm1, %v427_v0  ;;  %371 = vmatpush3.bf16.msra.mxu1 %v412_v5  ;;  %v321_v18 = vld [vmem:[%s562_s2] ss:$0 sm:$0xff] }
   0x8   :  { %372 = vmatprep.subr.bf16.mxu1 %v427_v0  ;;  %389 = vmatpush3.bf16.msra.mxu0 %v419_v12  ;;  %v324_v28 = vld [vmem:[%s563_s4] ss:$0 sm:$0xff] }
   0x9   :  { %390 = vmatprep.subr.bf16.mxu0 %v427_v0  ;;  %v333_v36 = vld [vmem:[%s564_s6] ss:$0 sm:$0xff] }
   0xb   :  { %373 = vmatpush3.bf16.msra.mxu1 %v413_v6 }
   0xc   :  { %374 = vmatprep.subr.bf16.mxu1 %v427_v0  ;;  %391 = vmatpush3.bf16.msra.mxu0 %v420_v13 }
   0xd   :  { %392 = vmatprep.subr.bf16.mxu0 %v427_v0 }
   0xf   :  { %375 = vmatpush3.bf16.msra.mxu1 %v414_v7 }
  0x10   :  { %376 = vmatprep.subr.bf16.mxu1 %v427_v0  ;;  %393 = vmatpush3.bf16.msra.mxu0 %v421_v14 }
  0x11   :  { %394 = vmatprep.subr.bf16.mxu0 %v427_v0 }
  0x13   :  { %377 = vmatpush3.bf16.msra.mxu1 %v415_v8 }
  0x14   :  { %378 = vmatprep.subr.bf16.mxu1 %v427_v0  ;;  %395 = vmatpush3.bf16.msra.mxu0 %v422_v15 }
  0x15   :  { %396 = vmatprep.subr.bf16.mxu0 %v427_v0 }
  0x17   :  { %379 = vmatpush3.bf16.msra.mxu1 %v416_v9 }
  0x18   :  { %380 = vmatprep.subr.bf16.mxu1 %v427_v0  ;;  %397 = vmatpush3.bf16.msra.mxu0 %v423_v16 }
  0x19   :  { %398 = vmatprep.subr.bf16.mxu0 %v427_v0 }
  0x1b   :  { %381 = vmatpush3.bf16.msra.mxu1 %v417_v10 }
  0x1c   :  { %382 = vmatprep.subr.bf16.mxu1 %v427_v0  ;;  %399 = vmatpush3.bf16.msra.mxu0 %v424_v17 }
  0x1d   :  { %400 = vmatprep.subr.bf16.mxu0 %v427_v0 }
  0x1f   :  { %383 = vmatpush3.bf16.msra.mxu1 %v418_v11 }
  0x20   :  { %401 = vmatpush3.bf16.msra.mxu0 %v425_v26 }
  0x21   :  { %402 = vmatprep.subr.bf16.mxu0 %v427_v0 }
  0x24   :  { %403 = vmatpush3.bf16.msra.mxu0 %v426_v27 }
  0xd9   :  { %v84_v19 = vpop.f32.mrb[0].mxu0 }
  0xda   :  { %v85_v20 = vadd.f32 %v321_v18, %v84_v19  ;;  %v366_v21 = vpop.f32.mrb[1].mxu0 }
  0xdb   :  { %v87_v22 = vpop.f32.mrb[2].mxu0 }
  0xdc   :  { %v90_v23 = vmax.f32 %v85_v20, 0.0  ;;  %v367_v24 = vpop.f32.mrb[3].mxu0 }
  0xde   :  { %v91_v25 = vpack.c.bf16 %v90_v23, %v90_v23 }
  0xe0   :  { %385 = vmatmul.mubr.bf16.vlgmr.msra.gmra.mrb[0].mxu1 %v91_v25 }
 0x1b3   :  { %v197_v29 = vpop.f32.mrb[0].mxu1 }
 0x1b4   :  { %v198_v30 = vadd.f32 %v324_v28, %v197_v29  ;;  %v386_v31 = vpop.f32.mrb[1].mxu1 }
 0x1b5   :  { %v200_v32 = vpop.f32.mrb[2].mxu1 }
 0x1b6   :  { %v203_v33 = vmax.f32 %v198_v30, 0.0  ;;  %v387_v34 = vpop.f32.mrb[3].mxu1 }
 0x1b8   :  { %v204_v35 = vpack.c.bf16 %v203_v33, %v203_v33 }
 0x1ba   :  { %405 = vmatmul.mubr.bf16.vlgmr.msra.gmra.mrb[4].mxu0 %v204_v35 }
 0x28d   :  { %v310_v37 = vpop.f32.mrb[4].mxu0 }
 0x28e   :  { %v311_v38 = vadd.f32 %v333_v36, %v310_v37  ;;  %v406_v39 = vpop.f32.mrb[5].mxu0 }
 0x28f   :  { %v313_v40 = vpop.f32.mrb[6].mxu0 }
 0x290   :  { %316 = vst [vmem:[%s565_s7] sm:$0xff] %v311_v38  ;;  %v407_v41 = vpop.f32.mrb[7].mxu0 }

// kernel: lstm_mlp_forward.2
= control target key start
LH: loop header
LB: loop body
LE: loop exit
PB: predicated region body
PF: predicated region fallthrough
CT: control target
= control target key end

     0   :  { %s2319_s27 = smov 0   ;;  %s2321_s28 = smov 0   ;;  %s2939_s0 = inlined_call_operand.vmem [shape: f32[8,8,6], index: 0, kind: input, shape index: {}]   ;;  %s2940_s1 = inlined_call_operand.vmem [shape: bf16[6,128], index: 1, kind: input, shape index: {}]   ;;  %s2941_s2 = inlined_call_operand.vmem [shape: f32[1,128], index: 2, kind: input, shape index: {}]   ;;  %s2942_s3 = inlined_call_operand.vmem [shape: bf16[128,512], index: 3, kind: input, shape index: {}]   ;;  %s2943_s4 = inlined_call_operand.vmem [shape: f32[1,512], index: 4, kind: input, shape index: {}]   ;;  %s2944_s5 = inlined_call_operand.vmem [shape: f32[128,512], index: 5, kind: input, shape index: {}]   ;;  %s2945_s6 = inlined_call_operand.vmem [shape: bf16[128,128], index: 6, kind: input, shape index: {}]   ;;  %s2946_s7 = inlined_call_operand.vmem [shape: f32[1,128], index: 7, kind: input, shape index: {}]   ;;  %s2947_s8 = inlined_call_operand.vmem [shape: bf16[8,8,128], index: 8, kind: output, shape index: {}]  }
   0x1   :  { %s2323_s29 = smov 0  }
   0x2 LB: > { %s27_s30 = sadd.s32 1, %s2265_s28  ;;  %p1757_p0 = scmp.ge.s32.totalorder %s2269_s29, 1  ;;  %s2269_s29 = sphi %s2323_s29, %s18_s29   ;;  %s2265_s28 = sphi %s2321_s28, %s2962_s28   ;;  %s2261_s27 = sphi %s2319_s27, %s2961_s27  }
   0x3   : > { %p28_p1 = scmp.ge.s32.totalorder %s27_s30, 2  ;;  %p282_p2 = scmp.lt.s32.totalorder %s2269_s29, 3 }
   0x5   : > { %s2964_s30 = smov (%p28_p1, %s27_s30), 0  ;;  %p283_p3 = pnand %p1757_p0, %p282_p2 }
   0x7   : > { %286 = sbr.rel (%p283_p3) target bundleno = 1516 (0x5ec), region = 52 }
   0xe   : > { %s1758_s9 = sshll.u32 %s2261_s27, 2  ;;  %p1762_p5 = scmp.ne.s32.totalorder %s2261_s27, 0 }
   0xf   : > { %p323_p4 = scmp.lt.s32.totalorder %s1758_s9, 7  ;;  %v2271_v0 = vmov (!%p1762_p5), 0.0  }
  0x10   : > { %344 = sbr.rel (%p1762_p5) target bundleno = 23 (0x17), region = 56  ;;  %345 = vst [vmem:[#allocation2] sm:$0xff] (!%p1762_p5), %v2271_v0  ;;  %346 = vst [vmem:[#allocation3] sm:$0xff] (!%p1762_p5), %v2271_v0 }
  0x11   : > { %s2966_s9 = smov (!%p323_p4, %s1758_s9), 7 }
  0x12   : > { %s1759_s10 = sshll.u32 %s2966_s9, 3  ;;  %s1761_s11 = sshll.u32 %s2966_s9, 2 }
  0x13   : > { %s329_s14 = scalar_lea.vmem %s2939_s0, %s1759_s10  ;;  %s2343_s17 = scalar_lea.vmem %s2947_s8, %s1761_s11 }
  0x17 PF: > { %v353_v1 = vld [vmem:[%s2940_s1] sm:$0x7]  ;;  %vm368_vm0 = vcmask 1042432   ;;  %v348_v3 = vld [vmem:[%s329_s14 + $0x8] sm:$0xff]  ;;  %vm361_vm1 = vcmask 48128   ;;  %v349_v6 = vld [vmem:[%s329_s14 + $0x10] sm:$0xff] }
  0x18   : > { %v347_v2 = vld [vmem:[%s329_s14] sm:$0xff]  ;;  %2115 = vmatprep.subr.msk.bf16.mxu0 %vm368_vm0, %v353_v1  ;;  %v370_v4 = vsel %vm368_vm0, %v353_v1, 0  ;;  %v350_v7 = vld [vmem:[%s329_s14 + $0x18] sm:$0xff]  ;;  %v764_v41 = vld [vmem:[%s2944_s5 + $0x8] sm:$0xff]  ;;  %v2272_v47 = vmov 0  }
  0x19   : > { %v351_v5 = vpack.c.bf16 %v348_v3, %v347_v2  ;;  %1834 = vmatpush3.bf16.msra.mxu0 %v370_v4  ;;  %v352_v8 = vpack.c.bf16 %v350_v7, %v349_v6  ;;  %v2143_v9 = vld [vmem:[%s2942_s3 + $0x4] ss:$16 sps:$4 sm:$0xff]   ;;  %v2145_v10 = vld [vmem:[%s2942_s3 + $0x8] ss:$16 sps:$4 sm:$0xff]   ;;  %v2147_v11 = vld [vmem:[%s2942_s3 + $0xc] ss:$16 sps:$4 sm:$0xff]   ;;  %673 = vmatprep.mubr.bf16.mxu1 %v2272_v47 }
  0x1a   : > { %641 = vmatprep.subr.bf16.mxu1 %v2143_v9  ;;  %v2148_v12 = vld [vmem:[%s2942_s3] ss:$16 sps:$4 sm:$0xff]   ;;  %694 = vmatprep.subr.bf16.mxu0 %v2147_v11  ;;  %v2149_v13 = vld [vmem:[%s2942_s3 + $0x24] ss:$16 sps:$4 sm:$0xff]   ;;  %v2151_v14 = vld [vmem:[%s2942_s3 + $0x28] ss:$16 sps:$4 sm:$0xff]  }
  0x1b   : > { %1835 = vmatprep.mubr.msk.bf16.mxu0 %vm361_vm1, %v351_v5  ;;  %642 = vmatpush1.bf16.msra.mxu1 %v2148_v12  ;;  %v2153_v15 = vld [vmem:[%s2942_s3 + $0x2c] ss:$16 sps:$4 sm:$0xff]   ;;  %v2154_v16 = vld [vmem:[%s2942_s3 + $0x20] ss:$16 sps:$4 sm:$0xff]   ;;  %v2155_v17 = vld [vmem:[%s2942_s3 + $0x44] ss:$16 sps:$4 sm:$0xff]  }
  0x1c   : > { %1836 = vmatmul.mubr.msk.bf16.vlgmr.msra.gmra.mrb[0].mxu0 %vm361_vm1, %v352_v8  ;;  %643 = vmatprep.subr.bf16.mxu1 %v2149_v13  ;;  %v2157_v18 = vld [vmem:[%s2942_s3 + $0x48] ss:$16 sps:$4 sm:$0xff]   ;;  %v2159_v19 = vld [vmem:[%s2942_s3 + $0x4c] ss:$16 sps:$4 sm:$0xff]   ;;  %v2160_v20 = vld [vmem:[%s2942_s3 + $0x40] ss:$16 sps:$4 sm:$0xff]  }
  0x1d   : > { %695 = vmatpush1.bf16.msra.mxu0 %v2145_v10  ;;  %v2161_v21 = vld [vmem:[%s2942_s3 + $0x64] ss:$16 sps:$4 sm:$0xff]   ;;  %v2165_v22 = vld [vmem:[%s2942_s3 + $0x6c] ss:$16 sps:$4 sm:$0xff]   ;;  %v2163_v23 = vld [vmem:[%s2942_s3 + $0x68] ss:$16 sps:$4 sm:$0xff]   ;;  %726 = vmatprep.mubr.bf16.mxu0 %v2272_v47 }
  0x1e   : > { %696 = vmatprep.subr.bf16.mxu0 %v2153_v15  ;;  %v2166_v24 = vld [vmem:[%s2942_s3 + $0x60] ss:$16 sps:$4 sm:$0xff]   ;;  %v2167_v25 = vld [vmem:[%s2942_s3 + $0x84] ss:$16 sps:$4 sm:$0xff]   ;;  %v2171_v26 = vld [vmem:[%s2942_s3 + $0x8c] ss:$16 sps:$4 sm:$0xff]  }
  0x1f   : > { %644 = vmatpush1.bf16.msra.mxu1 %v2154_v16  ;;  %v2169_v27 = vld [vmem:[%s2942_s3 + $0x88] ss:$16 sps:$4 sm:$0xff]   ;;  %v2172_v28 = vld [vmem:[%s2942_s3 + $0x80] ss:$16 sps:$4 sm:$0xff]   ;;  %v2173_v29 = vld [vmem:[%s2942_s3 + $0xa4] ss:$16 sps:$4 sm:$0xff]  }
  0x20   : > { %645 = vmatprep.subr.bf16.mxu1 %v2155_v17  ;;  %v2177_v30 = vld [vmem:[%s2942_s3 + $0xac] ss:$16 sps:$4 sm:$0xff]   ;;  %v2175_v31 = vld [vmem:[%s2942_s3 + $0xa8] ss:$16 sps:$4 sm:$0xff]   ;;  %v2178_v32 = vld [vmem:[%s2942_s3 + $0xa0] ss:$16 sps:$4 sm:$0xff]  }
  0x21   : > { %697 = vmatpush1.bf16.msra.mxu0 %v2151_v14  ;;  %v2179_v33 = vld [vmem:[%s2942_s3 + $0xc4] ss:$16 sps:$4 sm:$0xff]   ;;  %v2183_v34 = vld [vmem:[%s2942_s3 + $0xcc] ss:$16 sps:$4 sm:$0xff]   ;;  %v2181_v35 = vld [vmem:[%s2942_s3 + $0xc8] ss:$16 sps:$4 sm:$0xff]  }
  0x22   : > { %698 = vmatprep.subr.bf16.mxu0 %v2159_v19  ;;  %v2184_v36 = vld [vmem:[%s2942_s3 + $0xc0] ss:$16 sps:$4 sm:$0xff]   ;;  %v2185_v37 = vld [vmem:[%s2942_s3 + $0xe4] ss:$16 sps:$4 sm:$0xff]   ;;  %v2189_v38 = vld [vmem:[%s2942_s3 + $0xec] ss:$16 sps:$4 sm:$0xff]  }
  0x23   : > { %646 = vmatpush1.bf16.msra.mxu1 %v2160_v20  ;;  %v2187_v39 = vld [vmem:[%s2942_s3 + $0xe8] ss:$16 sps:$4 sm:$0xff]   ;;  %v2190_v40 = vld [vmem:[%s2942_s3 + $0xe0] ss:$16 sps:$4 sm:$0xff]  }
  0x24   : > { %647 = vmatprep.subr.bf16.mxu1 %v2161_v21  ;;  %v768_v42 = vld [vmem:[%s2944_s5 + $0x28] sm:$0xff]  ;;  %v766_v43 = vld [vmem:[%s2944_s5 + $0x18] sm:$0xff]  ;;  %v1763_v48 = vld [vmem:[%s2941_s2] ss:$0 sm:$0xff] }
  0x25   : > { %699 = vmatpush1.bf16.msra.mxu0 %v2157_v18  ;;  %v2453_v44 = vpack.c.bf16 %v768_v42, %v764_v41  ;;  %v770_v45 = vld [vmem:[%s2944_s5 + $0x38] sm:$0xff]  ;;  %v763_v56 = vld [vmem:[%s2944_s5] sm:$0xff]  ;;  %v765_v59 = vld [vmem:[%s2944_s5 + $0x10] sm:$0xff] }
  0x26   : > { %700 = vmatprep.subr.bf16.mxu0 %v2165_v22  ;;  %v2458_v46 = vpack.c.bf16 %v770_v45, %v766_v43  ;;  %v767_v57 = vld [vmem:[%s2944_s5 + $0x20] sm:$0xff]  ;;  %v769_v60 = vld [vmem:[%s2944_s5 + $0x30] sm:$0xff]  ;;  %v772_v61 = vld [vmem:[%s2944_s5 + $0x48] sm:$0xff] }
  0x27   : > { %648 = vmatpush1.bf16.msra.mxu1 %v2166_v24  ;;  %v776_v0 = vld [vmem:[%s2944_s5 + $0x68] sm:$0xff]  ;;  %v774_v1 = vld [vmem:[%s2944_s5 + $0x58] sm:$0xff]  ;;  %v2489_v6 = vpack.c.bf16 %v767_v57, %v763_v56  ;;  %v2491_v7 = vpack.c.bf16 %v769_v60, %v765_v59  ;;  %v771_v8 = vld [vmem:[%s2944_s5 + $0x40] sm:$0xff]  ;;  %v2948_v57 = vmov 0.0  }
  0x28   : > { %649 = vmatprep.subr.bf16.mxu1 %v2167_v25  ;;  %v778_v2 = vld [vmem:[%s2944_s5 + $0x78] sm:$0xff]  ;;  %v775_v9 = vld [vmem:[%s2944_s5 + $0x60] sm:$0xff]  ;;  %v2499_v11 = vpack.c.bf16 %v776_v0, %v772_v61  ;;  %v773_v13 = vld [vmem:[%s2944_s5 + $0x50] sm:$0xff] }
  0x29   : > { %701 = vmatpush1.bf16.msra.mxu0 %v2163_v23  ;;  %v2501_v12 = vpack.c.bf16 %v778_v2, %v774_v1  ;;  %v777_v14 = vld [vmem:[%s2944_s5 + $0x70] sm:$0xff]  ;;  %v780_v15 = vld [vmem:[%s2944_s5 + $0x88] sm:$0xff]  ;;  %v782_v17 = vld [vmem:[%s2944_s5 + $0x98] sm:$0xff]  ;;  %v2523_v19 = vpack.c.bf16 %v775_v9, %v771_v8 }
  0x2a   : > { %702 = vmatprep.subr.bf16.mxu0 %v2171_v26  ;;  %v784_v16 = vld [vmem:[%s2944_s5 + $0xa8] sm:$0xff]  ;;  %v786_v18 = vld [vmem:[%s2944_s5 + $0xb8] sm:$0xff]  ;;  %v2525_v20 = vpack.c.bf16 %v777_v14, %v773_v13  ;;  %v779_v21 = vld [vmem:[%s2944_s5 + $0x80] sm:$0xff] }
  0x2b   : > { %650 = vmatpush1.bf16.msra.mxu1 %v2172_v28  ;;  %v783_v22 = vld [vmem:[%s2944_s5 + $0xa0] sm:$0xff]  ;;  %v2535_v23 = vpack.c.bf16 %v784_v16, %v780_v15  ;;  %v2537_v24 = vpack.c.bf16 %v786_v18, %v782_v17  ;;  %v781_v25 = vld [vmem:[%s2944_s5 + $0x90] sm:$0xff]  ;;  %v792_v28 = vld [vmem:[%s2944_s5 + $0xe8] sm:$0xff] }
  0x2c   : > { %651 = vmatprep.subr.bf16.mxu1 %v2173_v29  ;;  %v785_v26 = vld [vmem:[%s2944_s5 + $0xb0] sm:$0xff]  ;;  %v790_v29 = vld [vmem:[%s2944_s5 + $0xd8] sm:$0xff]  ;;  %v803_v60 = vld [vmem:[%s2944_s5 + $0x140] sm:$0xff] }
  0x2d   : > { %703 = vmatpush1.bf16.msra.mxu0 %v2169_v27  ;;  %v788_v27 = vld [vmem:[%s2944_s5 + $0xc8] sm:$0xff]  ;;  %v798_v41 = vld [vmem:[%s2944_s5 + $0x118] sm:$0xff]  ;;  %v807_v61 = vld [vmem:[%s2944_s5 + $0x160] sm:$0xff] }
  0x2e   : > { %704 = vmatprep.subr.bf16.mxu0 %v2177_v30  ;;  %v794_v30 = vld [vmem:[%s2944_s5 + $0xf8] sm:$0xff]  ;;  %v805_v0 = vld [vmem:[%s2944_s5 + $0x150] sm:$0xff]  ;;  %v812_v2 = vld [vmem:[%s2944_s5 + $0x188] sm:$0xff]  ;;  %v2669_v8 = vpack.c.bf16 %v807_v61, %v803_v60 }
  0x2f   : > { %652 = vmatpush1.bf16.msra.mxu1 %v2178_v32  ;;  %v2561_v32 = vpack.c.bf16 %v785_v26, %v781_v25  ;;  %v802_v42 = vld [vmem:[%s2944_s5 + $0x138] sm:$0xff]  ;;  %v809_v1 = vld [vmem:[%s2944_s5 + $0x170] sm:$0xff]  ;;  %v815_v13 = vld [vmem:[%s2944_s5 + $0x1a0] sm:$0xff] }
  0x30   : > { %653 = vmatprep.subr.bf16.mxu1 %v2179_v33  ;;  %v787_v33 = vld [vmem:[%s2944_s5 + $0xc0] sm:$0xff]  ;;  %v810_v56 = vld [vmem:[%s2944_s5 + $0x178] sm:$0xff]  ;;  %v2671_v9 = vpack.c.bf16 %v809_v1, %v805_v0  ;;  %v813_v16 = vld [vmem:[%s2944_s5 + $0x190] sm:$0xff] }
  0x31   : > { %705 = vmatpush1.bf16.msra.mxu0 %v2175_v31  ;;  %v2559_v31 = vpack.c.bf16 %v783_v22, %v779_v21  ;;  %v817_v17 = vld [vmem:[%s2944_s5 + $0x1b0] sm:$0xff]  ;;  %v820_v18 = vld [vmem:[%s2944_s5 + $0x1c8] sm:$0xff]  ;;  %v822_v22 = vld [vmem:[%s2944_s5 + $0x1d8] sm:$0xff] }
  0x32   : > { %706 = vmatprep.subr.bf16.mxu0 %v2183_v34  ;;  %v791_v34 = vld [vmem:[%s2944_s5 + $0xe0] sm:$0xff]  ;;  %v824_v21 = vld [vmem:[%s2944_s5 + $0x1e8] sm:$0xff]  ;;  %v826_v25 = vld [vmem:[%s2944_s5 + $0x1f8] sm:$0xff] }
  0x33   : > { %654 = vmatpush1.bf16.msra.mxu1 %v2184_v36  ;;  %v2573_v36 = vpack.c.bf16 %v794_v30, %v790_v29  ;;  %v2595_v43 = vpack.c.bf16 %v791_v34, %v787_v33  ;;  %v2714_v29 = vpack.c.bf16 %v824_v21, %v820_v18  ;;  %v2716_v30 = vpack.c.bf16 %v826_v25, %v822_v22  ;;  %v823_v33 = vld [vmem:[%s2944_s5 + $0x1e0] sm:$0xff]  ;;  %v821_v34 = vld [vmem:[%s2944_s5 + $0x1d0] sm:$0xff] }
  0x34   : > { %655 = vmatprep.subr.bf16.mxu1 %v2185_v37  ;;  %v789_v37 = vld [vmem:[%s2944_s5 + $0xd0] sm:$0xff] }
  0x35   : > { %707 = vmatpush1.bf16.msra.mxu0 %v2181_v35  ;;  %v2571_v35 = vpack.c.bf16 %v792_v28, %v788_v27  ;;  %v2707_v27 = vpack.c.bf16 %v817_v17, %v813_v16  ;;  %v819_v28 = vld [vmem:[%s2944_s5 + $0x1c0] sm:$0xff] }
  0x36   : > { %708 = vmatprep.subr.bf16.mxu0 %v2189_v38  ;;  %v793_v38 = vld [vmem:[%s2944_s5 + $0xf0] sm:$0xff] }
  0x37   : > { %656 = vmatpush1.bf16.msra.mxu1 %v2190_v40  ;;  %v800_v40 = vld [vmem:[%s2944_s5 + $0x128] sm:$0xff]  ;;  %v2597_v45 = vpack.c.bf16 %v793_v38, %v789_v37  ;;  %v825_v37 = vld [vmem:[%s2944_s5 + $0x1f0] sm:$0xff]  ;;  %v2729_v38 = vpack.c.bf16 %v823_v33, %v819_v28 }
  0x38   : > { %1860 = vmatprep.subr.bf16.mxu1 %v2453_v44 }
  0x39   : > { %709 = vmatpush1.bf16.msra.mxu0 %v2187_v39  ;;  %v796_v39 = vld [vmem:[%s2944_s5 + $0x108] sm:$0xff] }
  0x3a   : > { %1892 = vmatprep.subr.bf16.mxu0 %v2458_v46 }
  0xef   : > { %v1837_v49 = vpop.f32.mrb[0].mxu0 }
  0xf0   : > { %v415_v50 = vadd.f32 %v1837_v49, %v1763_v48  ;;  %v406_v51 = vpop.f32.mrb[1].mxu0  ;;  %v2607_v49 = vpack.c.bf16 %v800_v40, %v796_v39  ;;  %v2731_v39 = vpack.c.bf16 %v825_v37, %v821_v34  ;;  %v827_v40 = vld [vmem:[#allocation2] sm:$0xff] }
  0xf1   : > { %v407_v52 = vadd.f32 %v1763_v48, %v406_v51  ;;  %v1838_v53 = vpop.f32.mrb[2].mxu0  ;;  %v797_v51 = vld [vmem:[%s2944_s5 + $0x110] sm:$0xff] }
  0xf2   : > { %v418_v54 = vadd.f32 %v1838_v53, %v1763_v48  ;;  %v409_v55 = vpop.f32.mrb[3].mxu0  ;;  %v423_v62 = vmax.f32 %v415_v50, 0.0  ;;  %v2609_v50 = vpack.c.bf16 %v802_v42, %v798_v41  ;;  %v804_v53 = vld [vmem:[%s2944_s5 + $0x148] sm:$0xff]  ;;  %v461_v41 = vlaneseq }
  0xf3   : > { %v410_v58 = vadd.f32 %v1763_v48, %v409_v55  ;;  %v421_v3 = vmax.f32 %v407_v52, 0.0  ;;  %v799_v48 = vld [vmem:[%s2944_s5 + $0x120] sm:$0xff]  ;;  %v801_v52 = vld [vmem:[%s2944_s5 + $0x130] sm:$0xff]  ;;  %v806_v55 = vld [vmem:[%s2944_s5 + $0x158] sm:$0xff] }
  0xf4   : > { %v424_v63 = vmax.f32 %v418_v54, 0.0  ;;  %v808_v54 = vld [vmem:[%s2944_s5 + $0x168] sm:$0xff]  ;;  %v2635_v59 = vpack.c.bf16 %v801_v52, %v797_v51  ;;  %v462_v42 = vshrl.u32 %v461_v41, 7  ;;  %v459_v51 = vld [vmem:[%s2943_s4] sm:$0xf] }
  0xf5   : > { %v422_v4 = vmax.f32 %v410_v58, 0.0 }
  0xf6   : > { %v426_v5 = vpack.c.bf16 %v424_v63, %v423_v62  ;;  %v2645_v62 = vpack.c.bf16 %v808_v54, %v804_v53  ;;  %v2647_v63 = vpack.c.bf16 %v810_v56, %v806_v55  ;;  %v467_v52 = vsub.s32 1, %v462_v42 }
  0xf7   : > { %v425_v10 = vpack.c.bf16 %v422_v4, %v421_v3  ;;  %v816_v3 = vld [vmem:[%s2944_s5 + $0x1a8] sm:$0xff]  ;;  %v814_v4 = vld [vmem:[%s2944_s5 + $0x198] sm:$0xff]  ;;  %v475_v53 = vsub.s32 3, %v462_v42 }
  0xf8   : > { %v2681_v14 = vpack.c.bf16 %v816_v3, %v812_v2  ;;  %v468_v1 = vrot.slane %v459_v51, %v467_v52 }
  0xf9   : > { %674 = vmatmul.mubr.bf16.vlgmr.msra.gmra.mrb[0].mxu1 %v425_v10  ;;  %727 = vmatmul.mubr.bf16.vlgmr.msra.gmra.mrb[4].mxu0 %v425_v10  ;;  %v811_v10 = vld [vmem:[%s2944_s5 + $0x180] sm:$0xff]  ;;  %v476_v2 = vrot.slane %v459_v51, %v475_v53 }
  0xfa   : > { %1862 = vmatpush1.bf16.msra.mxu1 %v2489_v6  ;;  %1894 = vmatpush1.bf16.msra.mxu0 %v2491_v7  ;;  %v2705_v26 = vpack.c.bf16 %v815_v13, %v811_v10 }
  0xfb   : > { %1864 = vmatprep.subr.bf16.mxu1 %v2499_v11  ;;  %1896 = vmatprep.subr.bf16.mxu0 %v2501_v12 }
  0xfc   : > { %683 = vmatprep.mubr.bf16.mxu1 %v2272_v47  ;;  %736 = vmatprep.mubr.bf16.mxu0 %v2272_v47  ;;  %v795_v47 = vld [vmem:[%s2944_s5 + $0x100] sm:$0xff] }
  0xfd   : > { %v2633_v58 = vpack.c.bf16 %v799_v48, %v795_v47  ;;  %v463_v47 = vsub.s32 0, %v462_v42  ;;  %v471_v48 = vsub.s32 2, %v462_v42 }
  0xfe   : > { %1866 = vmatpush1.bf16.msra.mxu1 %v2523_v19  ;;  %1898 = vmatpush1.bf16.msra.mxu0 %v2525_v20 }
  0xff   : > { %1868 = vmatprep.subr.bf16.mxu1 %v2535_v23  ;;  %1900 = vmatprep.subr.bf16.mxu0 %v2537_v24  ;;  %v464_v56 = vrot.slane %v459_v51, %v463_v47  ;;  %v472_v60 = vrot.slane %v459_v51, %v471_v48 }
 0x101   : > { %684 = vmatmul.mubr.bf16.gmra.mrb[4].mxu1 %v426_v5  ;;  %737 = vmatmul.mubr.bf16.gmra.mrb[8].mxu0 %v426_v5  ;;  %v818_v5 = vld [vmem:[%s2944_s5 + $0x1b8] sm:$0xff] }
 0x102   : > { %1870 = vmatpush1.bf16.msra.mxu1 %v2559_v31  ;;  %1902 = vmatpush1.bf16.msra.mxu0 %v2561_v32  ;;  %v2683_v15 = vpack.c.bf16 %v818_v5, %v814_v4 }
 0x103   : > { %1872 = vmatprep.subr.bf16.mxu1 %v2571_v35  ;;  %1904 = vmatprep.subr.bf16.mxu0 %v2573_v36 }
 0x104   : > { %900 = vmatprep.mubr.f32.mxu1 %v2948_v57  ;;  %971 = vmatprep.mubr.f32.mxu0 %v2948_v57 }
 0x106   : > { %1874 = vmatpush1.bf16.msra.mxu1 %v2595_v43  ;;  %1906 = vmatpush1.bf16.msra.mxu0 %v2597_v45 }
 0x107   : > { %1876 = vmatprep.subr.bf16.mxu1 %v2607_v49  ;;  %1908 = vmatprep.subr.bf16.mxu0 %v2609_v50 }
 0x10a   : > { %1878 = vmatpush1.bf16.msra.mxu1 %v2633_v58  ;;  %1910 = vmatpush1.bf16.msra.mxu0 %v2635_v59 }
 0x10b   : > { %1880 = vmatprep.subr.bf16.mxu1 %v2645_v62  ;;  %1912 = vmatprep.subr.bf16.mxu0 %v2647_v63 }
 0x10e   : > { %1882 = vmatpush1.bf16.msra.mxu1 %v2669_v8  ;;  %1914 = vmatpush1.bf16.msra.mxu0 %v2671_v9 }
 0x10f   : > { %1884 = vmatprep.subr.bf16.mxu1 %v2681_v14  ;;  %1916 = vmatprep.subr.bf16.mxu0 %v2683_v15 }
 0x112   : > { %1886 = vmatpush1.bf16.msra.mxu1 %v2705_v26  ;;  %1918 = vmatpush1.bf16.msra.mxu0 %v2707_v27 }
 0x113   : > { %1888 = vmatprep.subr.bf16.mxu1 %v2714_v29  ;;  %1920 = vmatprep.subr.bf16.mxu0 %v2716_v30 }
 0x116   : > { %1890 = vmatpush1.bf16.msra.mxu1 %v2729_v38  ;;  %1922 = vmatpush1.bf16.msra.mxu0 %v2731_v39 }
 0x117   : > { %1924 = vmatprep.subr.bf16.mxu1 %v2453_v44  ;;  %1956 = vmatprep.subr.bf16.mxu0 %v2458_v46 }
 0x119   : > { %901 = vmatmul.mubr.f32.vlgmr.msra.gmra.mrb[8].mxu1 %v827_v40  ;;  %972 = vmatmul.mubr.f32.vlgmr.msra.gmra.mrb[12].mxu0 %v827_v40 }
 0x11a   : > { %1926 = vmatpush1.bf16.msra.mxu1 %v2489_v6  ;;  %1958 = vmatpush1.bf16.msra.mxu0 %v2491_v7 }
 0x11b   : > { %1928 = vmatprep.subr.bf16.mxu1 %v2499_v11  ;;  %1960 = vmatprep.subr.bf16.mxu0 %v2501_v12 }
 0x11c   : > { %1072 = vmatprep.mubr.f32.mxu1 %v2948_v57  ;;  %1143 = vmatprep.mubr.f32.mxu0 %v2948_v57 }
 0x11e   : > { %1930 = vmatpush1.bf16.msra.mxu1 %v2523_v19  ;;  %1962 = vmatpush1.bf16.msra.mxu0 %v2525_v20 }
 0x11f   : > { %1932 = vmatprep.subr.bf16.mxu1 %v2535_v23  ;;  %1964 = vmatprep.subr.bf16.mxu0 %v2537_v24 }
 0x122   : > { %1934 = vmatpush1.bf16.msra.mxu1 %v2559_v31  ;;  %1966 = vmatpush1.bf16.msra.mxu0 %v2561_v32 }
 0x123   : > { %1936 = vmatprep.subr.bf16.mxu1 %v2571_v35  ;;  %1968 = vmatprep.subr.bf16.mxu0 %v2573_v36 }
 0x126   : > { %1938 = vmatpush1.bf16.msra.mxu1 %v2595_v43  ;;  %1970 = vmatpush1.bf16.msra.mxu0 %v2597_v45 }
 0x127   : > { %1940 = vmatprep.subr.bf16.mxu1 %v2607_v49  ;;  %1972 = vmatprep.subr.bf16.mxu0 %v2609_v50 }
 0x12a   : > { %1942 = vmatpush1.bf16.msra.mxu1 %v2633_v58  ;;  %1974 = vmatpush1.bf16.msra.mxu0 %v2635_v59 }
 0x12b   : > { %1944 = vmatprep.subr.bf16.mxu1 %v2645_v62  ;;  %1976 = vmatprep.subr.bf16.mxu0 %v2647_v63 }
 0x12e   : > { %1946 = vmatpush1.bf16.msra.mxu1 %v2669_v8  ;;  %1978 = vmatpush1.bf16.msra.mxu0 %v2671_v9 }
 0x12f   : > { %1948 = vmatprep.subr.bf16.mxu1 %v2681_v14  ;;  %1980 = vmatprep.subr.bf16.mxu0 %v2683_v15 }
 0x132   : > { %1950 = vmatpush1.bf16.msra.mxu1 %v2705_v26  ;;  %1982 = vmatpush1.bf16.msra.mxu0 %v2707_v27 }
 0x133   : > { %1952 = vmatprep.subr.bf16.mxu1 %v2714_v29  ;;  %1984 = vmatprep.subr.bf16.mxu0 %v2716_v30 }
 0x136   : > { %1954 = vmatpush1.bf16.msra.mxu1 %v2729_v38  ;;  %1986 = vmatpush1.bf16.msra.mxu0 %v2731_v39 }
 0x137   : > { %1988 = vmatprep.subr.bf16.mxu1 %v2453_v44  ;;  %2020 = vmatprep.subr.bf16.mxu0 %v2458_v46 }
 0x1cc   : > { %v675_v54 = vpop.f32.mrb[0].mxu1  ;;  %v728_v55 = vpop.f32.mrb[4].mxu0 }
 0x1cd   : > { %v677_v61 = vpop.f32.mrb[1].mxu1  ;;  %v730_v0 = vpop.f32.mrb[5].mxu0 }
 0x1ce   : > { %v679_v3 = vpop.f32.mrb[2].mxu1  ;;  %v732_v4 = vpop.f32.mrb[6].mxu0 }
 0x1cf   : > { %v2776_v5 = vadd.f32 %v679_v3, %v464_v56  ;;  %v2778_v10 = vadd.f32 %v732_v4, %v472_v60  ;;  %v681_v13 = vpop.f32.mrb[3].mxu1  ;;  %v734_v16 = vpop.f32.mrb[7].mxu0  ;;  %v676_v4 = vadd.f32 %v675_v54, %v464_v56 }
 0x1d0   : > { %v2780_v17 = vadd.f32 %v681_v13, %v468_v1  ;;  %v2782_v18 = vadd.f32 %v734_v16, %v476_v2  ;;  %v729_v13 = vadd.f32 %v728_v55, %v472_v60  ;;  %v678_v16 = vadd.f32 %v677_v61, %v468_v1 }
 0x1d4   : > { %v685_v21 = vpop.f32.mrb[4].mxu1  ;;  %v738_v22 = vpop.f32.mrb[8].mxu0 }
 0x1d5   : > { %v2784_v25 = vadd.f32 %v685_v21, %v464_v56  ;;  %v2786_v28 = vadd.f32 %v738_v22, %v472_v60  ;;  %v687_v33 = vpop.f32.mrb[5].mxu1  ;;  %v740_v34 = vpop.f32.mrb[9].mxu0  ;;  %v731_v21 = vadd.f32 %v730_v0, %v476_v2 }
 0x1d6   : > { %v2788_v37 = vadd.f32 %v687_v33, %v468_v1  ;;  %v2790_v40 = vadd.f32 %v740_v34, %v476_v2  ;;  %v689_v41 = vpop.f32.mrb[6].mxu1  ;;  %v742_v42 = vpop.f32.mrb[10].mxu0 }
 0x1d7   : > { %v2792_v47 = vadd.f32 %v689_v41, %v464_v56  ;;  %v2794_v48 = vadd.f32 %v742_v42, %v472_v60  ;;  %v691_v51 = vpop.f32.mrb[7].mxu1  ;;  %v744_v52 = vpop.f32.mrb[11].mxu0  ;;  %v828_v60 = vld [vmem:[#allocation3] sm:$0xff] }
 0x1d8   : > { %2950 = vst [vmem:[#allocation6_spill] sm:$0xff] %v2788_v37  ;;  %2951 = vst [vmem:[#allocation7_spill] sm:$0xff] %v2790_v40  ;;  %v2796_v53 = vadd.f32 %v691_v51, %v468_v1  ;;  %v2798_v3 = vadd.f32 %v744_v52, %v476_v2 }
 0x1d9   : > { %2952 = vst [vmem:[#allocation8_spill] sm:$0xff] %v2792_v47  ;;  %2953 = vst [vmem:[#allocation9_spill] sm:$0xff] %v2794_v48 }
 0x1da   : > { %2954 = vst [vmem:[#allocation10_spill] sm:$0xff] %v2798_v3 }
 0x1ec   : > { %v902_v22 = vpop.f32.mrb[8].mxu1  ;;  %v973_v33 = vpop.f32.mrb[12].mxu0 }
 0x1ed   : > { %v978_v34 = vadd.f32 %v902_v22, %v676_v4  ;;  %v980_v57 = vadd.f32 %v973_v33, %v729_v13  ;;  %v904_v40 = vpop.f32.mrb[9].mxu1  ;;  %v975_v37 = vpop.f32.mrb[13].mxu0 }
 0x1ee   : > { %v979_v41 = vadd.f32 %v904_v40, %v678_v16  ;;  %v981_v47 = vadd.f32 %v975_v37, %v731_v21 }
 0x1ef   : > { %v982_v42 = vmul.f32 0.5, %v978_v34 }
 0x1f0   : > { %v986_v48 = vmul.f32 0.5, %v979_v41  ;;  %v991_v51 = vmul.f32 0.5, %v981_v47 }
 0x1f1   : > { %2199 = vtanh.f32 %v982_v42 }
 0x1f2   : > { %2201 = vtanh.f32 %v986_v48 }
 0x1f3   : > { %2203 = vtanh.f32 %v980_v57 }
 0x1f4   : > { %2205 = vtanh.f32 %v991_v51 }
 0x1fb   : > { %v2200_v52 = vpop.eup %2199 }
 0x1fc   : > { %v2202_v3 = vpop.eup %2201  ;;  %v984_v54 = vmul.f32 0.5, %v2200_v52 }
 0x1fd   : > { %v988_v55 = vmul.f32 0.5, %v2202_v3  ;;  %v2204_v61 = vpop.eup %2203  ;;  %v2955_v3 = vmov 0.0  }
 0x1fe   : > { %v985_v56 = vadd.f32 0.5, %v984_v54  ;;  %v2206_v37 = vpop.eup %2205 }
 0x1ff   : > { %v989_v0 = vadd.f32 0.5, %v988_v55  ;;  %v993_v40 = vmul.f32 0.5, %v2206_v37 }
 0x200   : > { %v996_v1 = vmul.f32 %v2204_v61, %v985_v56 }
 0x201   : > { %v995_v2 = vmul.f32 %v989_v0, %v828_v60  ;;  %v994_v48 = vadd.f32 0.5, %v993_v40 }
 0x203   : > { %v2800_v4 = vadd.f32 %v996_v1, %v995_v2 }
 0x205   : > { %2207 = vtanh.f32 %v2800_v4 }
 0x20f   : > { %v2208_v57 = vpop.eup %2207 }
 0x210   : > { %v2803_v47 = vmul.f32 %v2208_v57, %v994_v48  ;;  %v2195_v48 = vld [vmem:[%s2945_s6 + $0x20] sm:$0xff]   ;;  %v2196_v57 = vld [vmem:[%s2945_s6 + $0x28] sm:$0xff]  }
 0x212   : > { %1073 = vmatmul.mubr.f32.vlgmr.msra.gmra.mrb[10].mxu1 %v2803_v47  ;;  %1144 = vmatmul.mubr.f32.vlgmr.msra.gmra.mrb[14].mxu0 %v2803_v47 }
 0x213   : > { %1990 = vmatpush1.bf16.msra.mxu1 %v2489_v6  ;;  %2022 = vmatpush1.bf16.msra.mxu0 %v2491_v7 }
 0x214   : > { %1992 = vmatprep.subr.bf16.mxu1 %v2499_v11  ;;  %2024 = vmatprep.subr.bf16.mxu0 %v2501_v12 }
 0x215   : > { %1245 = vmatprep.mubr.f32.mxu1 %v2955_v3  ;;  %1316 = vmatprep.mubr.f32.mxu0 %v2955_v3 }
 0x217   : > { %1994 = vmatpush1.bf16.msra.mxu1 %v2523_v19  ;;  %2026 = vmatpush1.bf16.msra.mxu0 %v2525_v20 }
 0x218   : > { %1996 = vmatprep.subr.bf16.mxu1 %v2535_v23  ;;  %2028 = vmatprep.subr.bf16.mxu0 %v2537_v24 }
 0x21b   : > { %1998 = vmatpush1.bf16.msra.mxu1 %v2559_v31  ;;  %2030 = vmatpush1.bf16.msra.mxu0 %v2561_v32 }
 0x21c   : > { %2000 = vmatprep.subr.bf16.mxu1 %v2571_v35  ;;  %2032 = vmatprep.subr.bf16.mxu0 %v2573_v36 }
 0x21f   : > { %2002 = vmatpush1.bf16.msra.mxu1 %v2595_v43  ;;  %2034 = vmatpush1.bf16.msra.mxu0 %v2597_v45 }
 0x220   : > { %2004 = vmatprep.subr.bf16.mxu1 %v2607_v49  ;;  %2036 = vmatprep.subr.bf16.mxu0 %v2609_v50 }
 0x223   : > { %2006 = vmatpush1.bf16.msra.mxu1 %v2633_v58  ;;  %2038 = vmatpush1.bf16.msra.mxu0 %v2635_v59 }
 0x224   : > { %2008 = vmatprep.subr.bf16.mxu1 %v2645_v62  ;;  %2040 = vmatprep.subr.bf16.mxu0 %v2647_v63 }
 0x227   : > { %2010 = vmatpush1.bf16.msra.mxu1 %v2669_v8  ;;  %2042 = vmatpush1.bf16.msra.mxu0 %v2671_v9 }
 0x228   : > { %2012 = vmatprep.subr.bf16.mxu1 %v2681_v14  ;;  %2044 = vmatprep.subr.bf16.mxu0 %v2683_v15 }
 0x22b   : > { %2014 = vmatpush1.bf16.msra.mxu1 %v2705_v26  ;;  %2046 = vmatpush1.bf16.msra.mxu0 %v2707_v27 }
 0x22c   : > { %2016 = vmatprep.subr.bf16.mxu1 %v2714_v29  ;;  %2048 = vmatprep.subr.bf16.mxu0 %v2716_v30 }
 0x22f   : > { %2018 = vmatpush1.bf16.msra.mxu1 %v2729_v38  ;;  %2050 = vmatpush1.bf16.msra.mxu0 %v2731_v39 }
 0x230   : > { %2052 = vmatprep.subr.bf16.mxu1 %v2453_v44  ;;  %2084 = vmatprep.subr.bf16.mxu0 %v2458_v46 }
 0x2e5   : > { %v1074_v13 = vpop.f32.mrb[10].mxu1  ;;  %v1145_v16 = vpop.f32.mrb[14].mxu0 }
 0x2e6   : > { %v1150_v21 = vadd.f32 %v1074_v13, %v2776_v5  ;;  %v1152_v22 = vadd.f32 %v1145_v16, %v2778_v10  ;;  %v1076_v33 = vpop.f32.mrb[11].mxu1  ;;  %v1147_v34 = vpop.f32.mrb[15].mxu0 }
 0x2e7   : > { %v1151_v41 = vadd.f32 %v1076_v33, %v2780_v17  ;;  %v1153_v42 = vadd.f32 %v1147_v34, %v2782_v18  ;;  %v2959_v33 = vld [vmem:[#allocation9_spill] sm:$0xff] }
 0x2e8   : > { %v1154_v51 = vmul.f32 0.5, %v1150_v21  ;;  %v2958_v21 = vld [vmem:[#allocation8_spill] sm:$0xff] }
 0x2e9   : > { %v1158_v52 = vmul.f32 0.5, %v1151_v41  ;;  %v1163_v44 = vmul.f32 0.5, %v1153_v42 }
 0x2ea   : > { %2209 = vtanh.f32 %v1154_v51 }
 0x2eb   : > { %2211 = vtanh.f32 %v1158_v52  ;;  %v2960_v52 = vld [vmem:[#allocation10_spill] sm:$0xff] }
 0x2ec   : > { %2213 = vtanh.f32 %v1152_v22 }
 0x2ed   : > { %2215 = vtanh.f32 %v1163_v44 }
 0x2f4   : > { %v2210_v54 = vpop.eup %2209 }
 0x2f5   : > { %v2212_v46 = vpop.eup %2211  ;;  %v1156_v55 = vmul.f32 0.5, %v2210_v54 }
 0x2f6   : > { %v1160_v56 = vmul.f32 0.5, %v2212_v46  ;;  %v2214_v60 = vpop.eup %2213 }
 0x2f7   : > { %v1157_v5 = vadd.f32 0.5, %v1156_v55  ;;  %v2216_v18 = vpop.eup %2215 }
 0x2f8   : > { %v1161_v10 = vadd.f32 0.5, %v1160_v56  ;;  %v1165_v1 = vmul.f32 0.5, %v2216_v18 }
 0x2f9   : > { %v1168_v61 = vmul.f32 %v2214_v60, %v1157_v5 }
 0x2fa   : > { %v1167_v0 = vmul.f32 %v1161_v10, %v2800_v4  ;;  %v1166_v2 = vadd.f32 0.5, %v1165_v1  ;;  %v2194_v4 = vld [vmem:[%s2945_s6 + $0x18] sm:$0xff]  }
 0x2fc   : > { %v2846_v17 = vadd.f32 %v1168_v61, %v1167_v0 }
 0x2fe   : > { %2217 = vtanh.f32 %v2846_v17 }
 0x308   : > { %v2218_v37 = vpop.eup %2217 }
 0x309   : > { %v2849_v40 = vmul.f32 %v2218_v37, %v1166_v2 }
 0x30b   : > { %1246 = vmatmul.mubr.f32.vlgmr.msra.gmra.mrb[12].mxu1 %v2849_v40  ;;  %1317 = vmatmul.mubr.f32.vlgmr.msra.gmra.mrb[16].mxu0 %v2849_v40 }
 0x30c   : > { %2054 = vmatpush1.bf16.msra.mxu1 %v2489_v6  ;;  %2086 = vmatpush1.bf16.msra.mxu0 %v2491_v7 }
 0x30d   : > { %2056 = vmatprep.subr.bf16.mxu1 %v2499_v11  ;;  %2088 = vmatprep.subr.bf16.mxu0 %v2501_v12 }
 0x30e   : > { %1418 = vmatprep.mubr.f32.mxu1 %v2955_v3  ;;  %1489 = vmatprep.mubr.f32.mxu0 %v2955_v3  ;;  %v2198_v3 = vld [vmem:[%s2945_s6 + $0x38] sm:$0xff]  }
 0x310   : > { %2058 = vmatpush1.bf16.msra.mxu1 %v2523_v19  ;;  %2090 = vmatpush1.bf16.msra.mxu0 %v2525_v20 }
 0x311   : > { %2060 = vmatprep.subr.bf16.mxu1 %v2535_v23  ;;  %2092 = vmatprep.subr.bf16.mxu0 %v2537_v24  ;;  %v2956_v23 = vld [vmem:[#allocation6_spill] sm:$0xff] }
 0x314   : > { %2062 = vmatpush1.bf16.msra.mxu1 %v2559_v31  ;;  %2094 = vmatpush1.bf16.msra.mxu0 %v2561_v32  ;;  %v2957_v31 = vld [vmem:[#allocation7_spill] sm:$0xff] }
 0x315   : > { %2064 = vmatprep.subr.bf16.mxu1 %v2571_v35  ;;  %2096 = vmatprep.subr.bf16.mxu0 %v2573_v36 }
 0x318   : > { %2066 = vmatpush1.bf16.msra.mxu1 %v2595_v43  ;;  %2098 = vmatpush1.bf16.msra.mxu0 %v2597_v45 }
 0x319   : > { %2068 = vmatprep.subr.bf16.mxu1 %v2607_v49  ;;  %2100 = vmatprep.subr.bf16.mxu0 %v2609_v50 }
 0x31c   : > { %2070 = vmatpush1.bf16.msra.mxu1 %v2633_v58  ;;  %2102 = vmatpush1.bf16.msra.mxu0 %v2635_v59 }
 0x31d   : > { %2072 = vmatprep.subr.bf16.mxu1 %v2645_v62  ;;  %2104 = vmatprep.subr.bf16.mxu0 %v2647_v63 }
 0x320   : > { %2074 = vmatpush1.bf16.msra.mxu1 %v2669_v8  ;;  %2106 = vmatpush1.bf16.msra.mxu0 %v2671_v9 }
 0x321   : > { %2076 = vmatprep.subr.bf16.mxu1 %v2681_v14  ;;  %2108 = vmatprep.subr.bf16.mxu0 %v2683_v15 }
 0x324   : > { %2078 = vmatpush1.bf16.msra.mxu1 %v2705_v26  ;;  %2110 = vmatpush1.bf16.msra.mxu0 %v2707_v27 }
 0x325   : > { %2080 = vmatprep.subr.bf16.mxu1 %v2714_v29  ;;  %2112 = vmatprep.subr.bf16.mxu0 %v2716_v30 }
 0x328   : > { %2082 = vmatpush1.bf16.msra.mxu1 %v2729_v38  ;;  %2114 = vmatpush1.bf16.msra.mxu0 %v2731_v39  ;;  %v1526_v38 = vpack.c.bf16 %v2849_v40, %v2803_v47  ;;  %v2191_v39 = vld [vmem:[%s2945_s6] sm:$0xff]   ;;  %v2197_v47 = vld [vmem:[%s2945_s6 + $0x30] sm:$0xff]  }
 0x329   : > { %1839 = vmatprep.subr.bf16.mxu1 %v2191_v39 }
 0x3de   : > { %v1247_v6 = vpop.f32.mrb[12].mxu1  ;;  %v1318_v7 = vpop.f32.mrb[16].mxu0 }
 0x3df   : > { %v1323_v11 = vadd.f32 %v1247_v6, %v2784_v25  ;;  %v1325_v12 = vadd.f32 %v1318_v7, %v2786_v28  ;;  %v1249_v19 = vpop.f32.mrb[13].mxu1  ;;  %v1320_v20 = vpop.f32.mrb[17].mxu0  ;;  %v2192_v25 = vld [vmem:[%s2945_s6 + $0x8] sm:$0xff]   ;;  %v2193_v28 = vld [vmem:[%s2945_s6 + $0x10] sm:$0xff]  }
 0x3e0   : > { %v1324_v24 = vadd.f32 %v1249_v19, %v2956_v23  ;;  %v1326_v32 = vadd.f32 %v1320_v20, %v2957_v31 }
 0x3e1   : > { %v1327_v35 = vmul.f32 0.5, %v1323_v11 }
 0x3e2   : > { %v1331_v36 = vmul.f32 0.5, %v1324_v24  ;;  %v1336_v43 = vmul.f32 0.5, %v1326_v32 }
 0x3e3   : > { %2219 = vtanh.f32 %v1327_v35 }
 0x3e4   : > { %2221 = vtanh.f32 %v1331_v36 }
 0x3e5   : > { %2223 = vtanh.f32 %v1325_v12  ;;  %v1798_v12 = vld [vmem:[%s2946_s7] ss:$0 sm:$0xff] }
 0x3e6   : > { %2225 = vtanh.f32 %v1336_v43 }
 0x3ed   : > { %v2220_v45 = vpop.eup %2219 }
 0x3ee   : > { %v2222_v49 = vpop.eup %2221  ;;  %v1329_v50 = vmul.f32 0.5, %v2220_v45 }
 0x3ef   : > { %v1333_v58 = vmul.f32 0.5, %v2222_v49  ;;  %v2224_v62 = vpop.eup %2223 }
 0x3f0   : > { %v1330_v59 = vadd.f32 0.5, %v1329_v50  ;;  %v2226_v15 = vpop.eup %2225 }
 0x3f1   : > { %v1334_v63 = vadd.f32 0.5, %v1333_v58  ;;  %v1338_v26 = vmul.f32 0.5, %v2226_v15 }
 0x3f2   : > { %v1341_v8 = vmul.f32 %v2224_v62, %v1330_v59 }
 0x3f3   : > { %v1340_v9 = vmul.f32 %v1334_v63, %v2846_v17  ;;  %v1339_v27 = vadd.f32 0.5, %v1338_v26 }
 0x3f5   : > { %v1342_v14 = vadd.f32 %v1341_v8, %v1340_v9 }
 0x3f7   : > { %2227 = vtanh.f32 %v1342_v14 }
 0x401   : > { %v2228_v29 = vpop.eup %2227 }
 0x402   : > { %v2890_v30 = vmul.f32 %v2228_v29, %v1339_v27 }
 0x404   : > { %1419 = vmatmul.mubr.f32.vlgmr.msra.gmra.mrb[14].mxu1 %v2890_v30  ;;  %1490 = vmatmul.mubr.f32.vlgmr.msra.gmra.mrb[18].mxu0 %v2890_v30 }
 0x405   : > { %1855 = vmatprep.mubr.bf16.mxu1 %v1526_v38  ;;  %1840 = vmatpush3.bf16.msra.mxu1 %v2191_v39 }
 0x406   : > { %1841 = vmatprep.subr.bf16.mxu1 %v2192_v25 }
 0x409   : > { %1842 = vmatpush3.bf16.msra.mxu1 %v2192_v25 }
 0x40a   : > { %1843 = vmatprep.subr.bf16.mxu1 %v2193_v28 }
 0x40d   : > { %1844 = vmatpush3.bf16.msra.mxu1 %v2193_v28 }
 0x40e   : > { %1845 = vmatprep.subr.bf16.mxu1 %v2194_v4 }
 0x411   : > { %1846 = vmatpush3.bf16.msra.mxu1 %v2194_v4 }
 0x412   : > { %1847 = vmatprep.subr.bf16.mxu1 %v2195_v48 }
 0x415   : > { %1848 = vmatpush3.bf16.msra.mxu1 %v2195_v48 }
 0x416   : > { %1849 = vmatprep.subr.bf16.mxu1 %v2196_v57 }
 0x419   : > { %1850 = vmatpush3.bf16.msra.mxu1 %v2196_v57 }
 0x41a   : > { %1851 = vmatprep.subr.bf16.mxu1 %v2197_v47 }
 0x41d   : > { %1852 = vmatpush3.bf16.msra.mxu1 %v2197_v47 }
 0x41e   : > { %1853 = vmatprep.subr.bf16.mxu1 %v2198_v3 }
 0x421   : > { %1854 = vmatpush3.bf16.msra.mxu1 %v2198_v3 }
 0x4d7   : > { %v1420_v13 = vpop.f32.mrb[14].mxu1  ;;  %v1491_v16 = vpop.f32.mrb[18].mxu0 }
 0x4d8   : > { %v1496_v22 = vadd.f32 %v1420_v13, %v2958_v21  ;;  %v1498_v34 = vadd.f32 %v1491_v16, %v2959_v33  ;;  %v1422_v41 = vpop.f32.mrb[15].mxu1  ;;  %v1493_v42 = vpop.f32.mrb[19].mxu0 }
 0x4d9   : > { %v1497_v51 = vadd.f32 %v1422_v41, %v2796_v53  ;;  %v1499_v44 = vadd.f32 %v1493_v42, %v2960_v52 }
 0x4da   : > { %v1500_v54 = vmul.f32 0.5, %v1496_v22 }
 0x4db   : > { %v1504_v46 = vmul.f32 0.5, %v1497_v51  ;;  %v1509_v55 = vmul.f32 0.5, %v1499_v44 }
 0x4dc   : > { %2229 = vtanh.f32 %v1500_v54 }
 0x4dd   : > { %2231 = vtanh.f32 %v1504_v46 }
 0x4de   : > { %2233 = vtanh.f32 %v1498_v34 }
 0x4df   : > { %2235 = vtanh.f32 %v1509_v55 }
 0x4e6   : > { %v2230_v56 = vpop.eup %2229 }
 0x4e7   : > { %v2232_v5 = vpop.eup %2231  ;;  %v1502_v60 = vmul.f32 0.5, %v2230_v56 }
 0x4e8   : > { %v1506_v10 = vmul.f32 0.5, %v2232_v5  ;;  %v2234_v0 = vpop.eup %2233 }
 0x4e9   : > { %v1503_v61 = vadd.f32 0.5, %v1502_v60  ;;  %v2236_v53 = vpop.eup %2235 }
 0x4ea   : > { %v1507_v17 = vadd.f32 0.5, %v1506_v10  ;;  %v1511_v37 = vmul.f32 0.5, %v2236_v53 }
 0x4eb   : > { %v1514_v18 = vmul.f32 %v2234_v0, %v1503_v61 }
 0x4ec   : > { %v1513_v1 = vmul.f32 %v1507_v17, %v1342_v14  ;;  %v1512_v40 = vadd.f32 0.5, %v1511_v37 }
 0x4ee   : > { %v1515_v2 = vadd.f32 %v1514_v18, %v1513_v1 }
 0x4f0   : > { %2237 = vtanh.f32 %v1515_v2  ;;  %1521 = vst [vmem:[#allocation3] sm:$0xff] %v1515_v2 }
 0x4fa   : > { %v2238_v6 = vpop.eup %2237 }
 0x4fb   : > { %v1517_v7 = vmul.f32 %v2238_v6, %v1512_v40 }
 0x4fd   : > { %1520 = vst [vmem:[#allocation2] sm:$0xff] %v1517_v7  ;;  %v1527_v11 = vpack.c.bf16 %v1517_v7, %v2890_v30 }
 0x4ff   : > { %1856 = vmatmul.mubr.bf16.vlgmr.msra.gmra.mrb[16].mxu1 %v1527_v11 }
 0x5d2   : > { %v1857_v19 = vpop.f32.mrb[16].mxu1 }
 0x5d3   : > { %v1642_v20 = vadd.f32 %v1857_v19, %v1798_v12  ;;  %v1633_v23 = vpop.f32.mrb[17].mxu1 }
 0x5d4   : > { %v1634_v24 = vadd.f32 %v1798_v12, %v1633_v23  ;;  %v1858_v31 = vpop.f32.mrb[18].mxu1 }
 0x5d5   : > { %v1650_v32 = vmul.f32 0.5, %v1642_v20  ;;  %v1645_v35 = vadd.f32 %v1858_v31, %v1798_v12  ;;  %v1636_v36 = vpop.f32.mrb[19].mxu1 }
 0x5d6   : > { %v1648_v43 = vmul.f32 0.5, %v1634_v24  ;;  %v1637_v45 = vadd.f32 %v1798_v12, %v1636_v36 }
 0x5d7   : > { %2239 = vtanh.f32 %v1650_v32  ;;  %v1651_v49 = vmul.f32 0.5, %v1645_v35 }
 0x5d8   : > { %2241 = vtanh.f32 %v1648_v43  ;;  %v1649_v50 = vmul.f32 0.5, %v1637_v45 }
 0x5d9   : > { %2243 = vtanh.f32 %v1651_v49 }
 0x5da   : > { %2245 = vtanh.f32 %v1649_v50 }
 0x5e1   : > { %v2240_v58 = vpop.eup %2239 }
 0x5e2   : > { %v2242_v59 = vpop.eup %2241  ;;  %v1658_v62 = vmul.f32 0.5, %v2240_v58 }
 0x5e3   : > { %v2244_v63 = vpop.eup %2243  ;;  %v1656_v8 = vmul.f32 0.5, %v2242_v59 }
 0x5e4   : > { %v2246_v9 = vpop.eup %2245  ;;  %v1659_v14 = vmul.f32 0.5, %v2244_v63  ;;  %v1662_v26 = vadd.f32 0.5, %v1658_v62 }
 0x5e5   : > { %v1657_v15 = vmul.f32 0.5, %v2246_v9  ;;  %v1660_v29 = vadd.f32 0.5, %v1656_v8 }
 0x5e6   : > { %v1663_v27 = vadd.f32 0.5, %v1659_v14 }
 0x5e7   : > { %v1661_v30 = vadd.f32 0.5, %v1657_v15 }
 0x5e8   : > { %v1817_v38 = vpack.c.bf16 %v1663_v27, %v1662_v26 }
 0x5e9   : > { %v1812_v39 = vpack.c.bf16 %v1661_v30, %v1660_v29 }
 0x5ea   : > { %1819 = vst [vmem:[%s2343_s17 + $0x8] sm:$0xff] %v1817_v38  }
 0x5eb   : > { %1813 = vst [vmem:[%s2343_s17] sm:$0xff] %v1812_v39  }
 0x5ec PF: > { %s18_s29 = sadd.s32 1, %s2269_s29   ;;  %s2961_s27 = smov %s2265_s28 }
 0x5ed   : > { %p15_p6 = scmp.ge.s32.totalorder %s18_s29, 4   ;;  %s2962_s28 = smov %s2964_s30 }
 0x5ef   :  { %17 = sbr.rel (!%p15_p6) target bundleno = 2 (0x2), region = 93 }

</bundles_post_ra>
